<compile_context>
chip_gen: v5e
topology: v5e:2x2
jax: 0.10.0
libtpu: 0.0.40
codegen_flags: <defaults>
</compile_context>

<pallas_src>
import math

import jax
import jax.numpy as jnp
from jax import lax
from jax.experimental import pallas as pl
from jax.experimental.pallas import tpu as pltpu

NEG_SLOPE = 0.01  # F.leaky_relu default negative_slope


def _leaky_relu(z):
    return jnp.where(z > 0, z, NEG_SLOPE * z)


def mlp_kernel(h_ref, wagg_ref, *rest):
    """One batch tile.

    h_ref    : (N, tb*C)  lane-dense tile of h viewed as (num_nodes, batch*in_size)
    wagg_ref : (C,)       agg Linear(in_size, 1) weights, in SMEM (scalar reads)
    rest     : (w0, b0f, w1, b1, ..., wf, bf, out_ref, y_scratch)
               w* are bf16 (in, out) weights; b* are f32 (1, out) biases;
               b0f already absorbs the agg bias.
    """
    out_ref, y_ref = rest[-2], rest[-1]
    wf_ref, bf_ref = rest[-4], rest[-3]
    dense_refs = rest[:-4]                      # (w0, b0f, w1, b1, ...)

    C = wagg_ref.shape[0]
    tb = out_ref.shape[0]

    # ---- layer 0: agg + dense_0 fused into one MXU matmul --------------------
    # y[b*C + c, :] = sum_n h[n, b, c] * w0[n, :]
    # Transposed-LHS contraction over the node axis: no explicit XLU transpose of
    # the (big) tile; bf16 operands, f32 accumulation.
    w0_ref, b0f_ref = dense_refs[0], dense_refs[1]
    t = h_ref[...].astype(jnp.bfloat16)
    y_ref[...] = lax.dot_general(
        t, w0_ref[...], (((0,), (0,)), ((), ())),
        preferred_element_type=jnp.float32)

    # Weighted de-interleave over in_size: x[b, :] = sum_c wagg[c] * y[b*C + c, :].
    # Sublane-strided reads (stride = C rows) from the VMEM scratch; wagg scalars
    # come from SMEM.
    x = wagg_ref[0] * y_ref[pl.ds(0, tb, stride=C), :]
    for c in range(1, C):
        x = x + wagg_ref[c] * y_ref[pl.ds(c, tb, stride=C), :]
    # TODO(synk): training-mode nn.Dropout RNG not emitted; eval-mode identity assumed.
    x = _leaky_relu(x + b0f_ref[...])           # b0f = agg_bias * sum_n w0 + b0

    # ---- remaining hidden layers + final (logit) layer ----------------------
    for j in range(2, len(dense_refs), 2):
        w_ref, b_ref = dense_refs[j], dense_refs[j + 1]
        x = _leaky_relu(
            jnp.dot(x.astype(jnp.bfloat16), w_ref[...],
                    preferred_element_type=jnp.float32) + b_ref[...])

    out = jnp.dot(x.astype(jnp.bfloat16), wf_ref[...],
                  preferred_element_type=jnp.float32) + bf_ref[...]
    out_ref[...] = out.astype(out_ref.dtype)


def mlp_forward(h, wagg, bagg, dense_params, final_params, *,
                block_b=2048, vmem_limit_bytes=48 * 1024 * 1024):
    """Eval-mode forward of the MLP head (in_size > 1, add_softmax=False).

    h            : (num_nodes, batch, in_size) float array
    wagg, bagg   : agg Linear(in_size, 1) weight (in_size,) and bias (scalar)
    dense_params : list of (w_i (in_i, out_i), b_i (out_i,)) hidden Linear layers,
                   with in_0 == num_nodes
    final_params : (wf (hidden[-1], out_size), bf (out_size,))
    returns      : (batch, out_size) float32 logits
    """
    N, B, C = h.shape
    w0, b0 = dense_params[0]
    H1 = w0.shape[1]
    wf, bf = final_params
    out_size = wf.shape[1]

    # --- batch tile: lane-dense h block needs tb*C % 128 == 0 (and tb % 8 == 0) ---
    tb = min(block_b, B)
    if tb < B:
        lane_step = 128 // math.gcd(C, 128)
        step = (8 * lane_step) // math.gcd(8, lane_step)    # lcm(8, lane_step)
        tb = (tb // step) * step
        if tb <= 0:
            tb = B
    grid = (pl.cdiv(B, tb),)

    # --- one-time parameter prep (outside the kernel) --------------------------
    # agg bias folded into the first dense bias (legal: dropout is identity in eval
    # mode and there is no nonlinearity between agg and dense_0).
    b0f = (jnp.asarray(bagg, jnp.float32) * jnp.sum(w0.astype(jnp.float32), axis=0)
           + b0.astype(jnp.float32)).reshape(1, -1)
    weight_inputs = [w0.astype(jnp.bfloat16), b0f]
    for (w_i, b_i) in dense_params[1:]:
        weight_inputs += [w_i.astype(jnp.bfloat16),
                          b_i.astype(jnp.float32).reshape(1, -1)]
    weight_inputs += [wf.astype(jnp.bfloat16),
                      bf.astype(jnp.float32).reshape(1, -1)]

    h2 = h.reshape(N, B * C)                      # free view: C is the contiguous last dim
    wagg_arr = wagg.astype(jnp.float32).reshape(C)

    def const_spec(a):
        nd = a.ndim
        return pl.BlockSpec(a.shape, lambda i, nd=nd: (0,) * nd)

    in_specs = [
        pl.BlockSpec((N, tb * C), lambda i: (0, i)),                 # lane-dense h tiles
        pl.BlockSpec((C,), lambda i: (0,),
                     memory_space=pltpu.MemorySpace.SMEM),           # agg scalars
    ] + [const_spec(a) for a in weight_inputs]                       # VMEM-resident weights

    # Advisory cost estimate so XLA can schedule around the call.
    flops = 2 * (B * C) * N * H1
    prev = H1
    for (w_i, _) in dense_params[1:]:
        flops += 2 * B * prev * w_i.shape[1]
        prev = w_i.shape[1]
    flops += 2 * B * prev * out_size
    bytes_accessed = int(h2.size * h2.dtype.itemsize
                         + sum(int(a.size) * a.dtype.itemsize for a in weight_inputs)
                         + wagg_arr.size * 4 + B * out_size * 4)

    return pl.pallas_call(
        mlp_kernel,
        out_shape=jax.ShapeDtypeStruct((B, out_size), jnp.float32),
        grid=grid,
        in_specs=in_specs,
        out_specs=pl.BlockSpec((tb, out_size), lambda i: (i, 0)),
        scratch_shapes=[pltpu.VMEM((tb * C, H1), jnp.float32)],
        compiler_params=pltpu.CompilerParams(
            dimension_semantics=("parallel",),      # megacore: batch tiles across TCs
            vmem_limit_bytes=int(vmem_limit_bytes)),
        cost_estimate=pl.CostEstimate(flops=int(flops), transcendentals=0,
                                      bytes_accessed=bytes_accessed),
    )(h2, wagg_arr, *weight_inputs)


def _reference(h, wagg, bagg, dense_params, final_params):
    """Pure-JAX (f32) reference mirroring the PyTorch forward exactly."""
    hh = h.astype(jnp.float32)
    z = jnp.einsum('nbc,c->nb', hh, wagg.astype(jnp.float32)) + bagg   # agg -> (N, B)
    x = z.T                                                            # transpose(2, 0)
    for (w_i, b_i) in dense_params:
        x = _leaky_relu(x @ w_i.astype(jnp.float32) + b_i.astype(jnp.float32))
    wf, bf = final_params
    return x @ wf.astype(jnp.float32) + bf.astype(jnp.float32)         # (B, out_size)


if __name__ == "__main__":
    num_nodes, in_size = 16, 4
    hidden_size = [32, 16]
    out_size = 8
    batch = 1024                      # 4 grid steps with block_b=256 -> exercises pipeline

    key = jax.random.PRNGKey(0)
    ks = jax.random.split(key, 12)

    def init(k, shape, fan_in):
        bound = 1.0 / (fan_in ** 0.5)
        return jax.random.uniform(k, shape, jnp.float32, -bound, bound)

    # input: (num_nodes, batch, in_size)
    h = jax.random.normal(ks[0], (num_nodes, batch, in_size), jnp.float32)

    # PyTorch-Linear-style uniform init; dense weights pre-transposed to (in, out).
    wagg = init(ks[1], (in_size,), in_size)        # Linear(in_size, 1).weight
    bagg = init(ks[2], (), in_size)                # Linear(in_size, 1).bias
    dense_params = []
    fan_in = num_nodes
    ki = 3
    for hdim in hidden_size:
        w = init(ks[ki], (fan_in, hdim), fan_in); ki += 1
        b = init(ks[ki], (hdim,), fan_in); ki += 1
        dense_params.append((w, b))
        fan_in = hdim
    wf = init(ks[ki], (fan_in, out_size), fan_in); ki += 1
    bf = init(ks[ki], (out_size,), fan_in); ki += 1
    final_params = (wf, bf)

    out = mlp_forward(h, wagg, bagg, dense_params, final_params, block_b=256)
    out = jax.block_until_ready(out)

    ref = _reference(h, wagg, bagg, dense_params, final_params)
    assert out.shape == (batch, out_size), out.shape
    max_err = float(jnp.max(jnp.abs(out - ref)))
    # bf16 MXU operands (deliberate, per perf review) -> ~1e-3 level absolute deltas.
    assert jnp.allclose(out, ref, atol=1e-2, rtol=1e-2), \
        f"mismatch vs reference (max abs err {max_err})"

    print("KERNEL_OK")
</pallas_src>

<mosaic_0001>
module attributes {stable_mosaic.version = 11 : i64} {
  func.func @mlp_kernel(%arg0: i32, %arg1: memref<16x1024xf32, #tpu.memory_space<vmem>>, %arg2: memref<4xf32, #tpu.memory_space<smem>>, %arg3: memref<16x32xbf16, #tpu.memory_space<vmem>>, %arg4: memref<1x32xf32, #tpu.memory_space<vmem>>, %arg5: memref<32x16xbf16, #tpu.memory_space<vmem>>, %arg6: memref<1x16xf32, #tpu.memory_space<vmem>>, %arg7: memref<16x8xbf16, #tpu.memory_space<vmem>>, %arg8: memref<1x8xf32, #tpu.memory_space<vmem>>, %arg9: memref<256x8xf32, #tpu.memory_space<vmem>>, %arg10: memref<1024x32xf32, #tpu.memory_space<vmem>>) attributes {dimension_semantics = [#tpu.dimension_semantics<parallel>], iteration_bounds = array<i64: 4>, scalar_prefetch = 0 : i64, scratch_operands = 1 : i64, tpu.core_type = #tpu.core_type<tc>, window_params = [{transform_indices = @transform_0, window_bounds = array<i64: 16, 1024>}, {transform_indices = @transform_1, window_bounds = array<i64: 4>}, {pipeline_mode = #tpu.pipeline_mode<synchronous>, transform_indices = @transform_2, window_bounds = array<i64: 16, 32>}, {pipeline_mode = #tpu.pipeline_mode<synchronous>, transform_indices = @transform_3, window_bounds = array<i64: 1, 32>}, {pipeline_mode = #tpu.pipeline_mode<synchronous>, transform_indices = @transform_4, window_bounds = array<i64: 32, 16>}, {pipeline_mode = #tpu.pipeline_mode<synchronous>, transform_indices = @transform_5, window_bounds = array<i64: 1, 16>}, {pipeline_mode = #tpu.pipeline_mode<synchronous>, transform_indices = @transform_6, window_bounds = array<i64: 16, 8>}, {pipeline_mode = #tpu.pipeline_mode<synchronous>, transform_indices = @transform_7, window_bounds = array<i64: 1, 8>}, {transform_indices = @transform_8, window_bounds = array<i64: 256, 8>}]} {
    %c0 = arith.constant 0 : index
    %c0_0 = arith.constant 0 : index
    %0 = vector.load %arg1[%c0, %c0_0] : memref<16x1024xf32, #tpu.memory_space<vmem>>, vector<16x1024xf32>
    %1 = arith.truncf %0 : vector<16x1024xf32> to vector<16x1024xbf16>
    %c0_1 = arith.constant 0 : index
    %c0_2 = arith.constant 0 : index
    %2 = vector.load %arg3[%c0_1, %c0_2] : memref<16x32xbf16, #tpu.memory_space<vmem>>, vector<16x32xbf16>
    %cst = arith.constant dense<0.000000e+00> : vector<1024x32xf32>
    %3 = tpu.matmul %1, %2, %cst {dimension_numbers = #tpu.dot_dimension_numbers<[0], [0], [1], [1], [0, 1, 1, 1], [], []>} : vector<16x1024xbf16>, vector<16x32xbf16>, vector<1024x32xf32> -> vector<1024x32xf32>
    %c0_3 = arith.constant 0 : index
    %c0_4 = arith.constant 0 : index
    %4 = vector.load %arg10[%c0_3, %c0_4] : memref<1024x32xf32, #tpu.memory_space<vmem>>, vector<1024x32xf32>
    tpu.vector_store %arg10[%c0_3, %c0_4], %3 {strides = array<i32>} : memref<1024x32xf32, #tpu.memory_space<vmem>>, vector<1024x32xf32>,
    %c0_5 = arith.constant 0 : index
    %5 = memref.load %arg2[%c0_5] : memref<4xf32, #tpu.memory_space<smem>>
    %c0_6 = arith.constant 0 : index
    %c0_7 = arith.constant 0 : index
    %6 = tpu.strided_load %arg10[%c0_6, %c0_7] {strides = array<i32: 4, 1>} : memref<1024x32xf32, #tpu.memory_space<vmem>>, vector<256x32xf32>
    %7 = vector.broadcast %5 : f32 to vector<256x32xf32>
    %8 = arith.mulf %7, %6 : vector<256x32xf32>
    %c1 = arith.constant 1 : index
    %9 = memref.load %arg2[%c1] : memref<4xf32, #tpu.memory_space<smem>>
    %c1_8 = arith.constant 1 : index
    %c0_9 = arith.constant 0 : index
    %10 = tpu.strided_load %arg10[%c1_8, %c0_9] {strides = array<i32: 4, 1>} : memref<1024x32xf32, #tpu.memory_space<vmem>>, vector<256x32xf32>
    %11 = vector.broadcast %9 : f32 to vector<256x32xf32>
    %12 = arith.mulf %11, %10 : vector<256x32xf32>
    %13 = arith.addf %8, %12 : vector<256x32xf32>
    %c2 = arith.constant 2 : index
    %14 = memref.load %arg2[%c2] : memref<4xf32, #tpu.memory_space<smem>>
    %c2_10 = arith.constant 2 : index
    %c0_11 = arith.constant 0 : index
    %15 = tpu.strided_load %arg10[%c2_10, %c0_11] {strides = array<i32: 4, 1>} : memref<1024x32xf32, #tpu.memory_space<vmem>>, vector<256x32xf32>
    %16 = vector.broadcast %14 : f32 to vector<256x32xf32>
    %17 = arith.mulf %16, %15 : vector<256x32xf32>
    %18 = arith.addf %13, %17 : vector<256x32xf32>
    %c3 = arith.constant 3 : index
    %19 = memref.load %arg2[%c3] : memref<4xf32, #tpu.memory_space<smem>>
    %c3_12 = arith.constant 3 : index
    %c0_13 = arith.constant 0 : index
    %20 = tpu.strided_load %arg10[%c3_12, %c0_13] {strides = array<i32: 4, 1>} : memref<1024x32xf32, #tpu.memory_space<vmem>>, vector<256x32xf32>
    %21 = vector.broadcast %19 : f32 to vector<256x32xf32>
    %22 = arith.mulf %21, %20 : vector<256x32xf32>
    %23 = arith.addf %18, %22 : vector<256x32xf32>
    %c0_14 = arith.constant 0 : index
    %c0_15 = arith.constant 0 : index
    %24 = vector.load %arg4[%c0_14, %c0_15] : memref<1x32xf32, #tpu.memory_space<vmem>>, vector<1x32xf32>
    %25 = vector.broadcast %24 : vector<1x32xf32> to vector<256x32xf32>
    %26 = arith.addf %23, %25 : vector<256x32xf32>
    %cst_16 = arith.constant 0.000000e+00 : f32
    %27 = vector.broadcast %cst_16 : f32 to vector<256x32xf32>
    %28 = arith.cmpf ogt, %26, %27 : vector<256x32xf32>
    %cst_17 = arith.constant 0.00999999977 : f32
    %29 = vector.broadcast %cst_17 : f32 to vector<256x32xf32>
    %30 = arith.mulf %29, %26 : vector<256x32xf32>
    %31 = arith.select %28, %26, %30 : vector<256x32xi1>, vector<256x32xf32>
    %32 = arith.truncf %31 : vector<256x32xf32> to vector<256x32xbf16>
    %c0_18 = arith.constant 0 : index
    %c0_19 = arith.constant 0 : index
    %33 = vector.load %arg5[%c0_18, %c0_19] : memref<32x16xbf16, #tpu.memory_space<vmem>>, vector<32x16xbf16>
    %cst_20 = arith.constant dense<0.000000e+00> : vector<256x16xf32>
    %34 = tpu.matmul %32, %33, %cst_20 {dimension_numbers = #tpu.dot_dimension_numbers<[1], [0], [0], [1], [0, 0, 1, 1], [], []>} : vector<256x32xbf16>, vector<32x16xbf16>, vector<256x16xf32> -> vector<256x16xf32>
    %c0_21 = arith.constant 0 : index
    %c0_22 = arith.constant 0 : index
    %35 = vector.load %arg6[%c0_21, %c0_22] : memref<1x16xf32, #tpu.memory_space<vmem>>, vector<1x16xf32>
    %36 = vector.broadcast %35 : vector<1x16xf32> to vector<256x16xf32>
    %37 = arith.addf %34, %36 : vector<256x16xf32>
    %cst_23 = arith.constant 0.000000e+00 : f32
    %38 = vector.broadcast %cst_23 : f32 to vector<256x16xf32>
    %39 = arith.cmpf ogt, %37, %38 : vector<256x16xf32>
    %cst_24 = arith.constant 0.00999999977 : f32
    %40 = vector.broadcast %cst_24 : f32 to vector<256x16xf32>
    %41 = arith.mulf %40, %37 : vector<256x16xf32>
    %42 = arith.select %39, %37, %41 : vector<256x16xi1>, vector<256x16xf32>
    %43 = arith.truncf %42 : vector<256x16xf32> to vector<256x16xbf16>
    %c0_25 = arith.constant 0 : index
    %c0_26 = arith.constant 0 : index
    %44 = vector.load %arg7[%c0_25, %c0_26] : memref<16x8xbf16, #tpu.memory_space<vmem>>, vector<16x8xbf16>
    %cst_27 = arith.constant dense<0.000000e+00> : vector<256x8xf32>
    %45 = tpu.matmul %43, %44, %cst_27 {dimension_numbers = #tpu.dot_dimension_numbers<[1], [0], [0], [1], [0, 0, 1, 1], [], []>} : vector<256x16xbf16>, vector<16x8xbf16>, vector<256x8xf32> -> vector<256x8xf32>
    %c0_28 = arith.constant 0 : index
    %c0_29 = arith.constant 0 : index
    %46 = vector.load %arg8[%c0_28, %c0_29] : memref<1x8xf32, #tpu.memory_space<vmem>>, vector<1x8xf32>
    %47 = vector.broadcast %46 : vector<1x8xf32> to vector<256x8xf32>
    %48 = arith.addf %45, %47 : vector<256x8xf32>
    %c0_30 = arith.constant 0 : index
    %c0_31 = arith.constant 0 : index
    %49 = vector.load %arg9[%c0_30, %c0_31] : memref<256x8xf32, #tpu.memory_space<vmem>>, vector<256x8xf32>
    tpu.vector_store %arg9[%c0_30, %c0_31], %48 {strides = array<i32>} : memref<256x8xf32, #tpu.memory_space<vmem>>, vector<256x8xf32>,
    return
  }
  func.func @transform_0(%arg0: i32) -> (i32, i32) {
    %c0_i32 = arith.constant 0 : i32
    %c0_i32_0 = arith.constant 0 : i32
    return %c0_i32, %arg0 : i32, i32
  }
  func.func @transform_1(%arg0: i32) -> i32 {
    %c0_i32 = arith.constant 0 : i32
    %c0_i32_0 = arith.constant 0 : i32
    return %c0_i32 : i32
  }
  func.func @transform_2(%arg0: i32) -> (i32, i32) {
    %c0_i32 = arith.constant 0 : i32
    %c0_i32_0 = arith.constant 0 : i32
    %c0_i32_1 = arith.constant 0 : i32
    return %c0_i32, %c0_i32_0 : i32, i32
  }
  func.func @transform_3(%arg0: i32) -> (i32, i32) {
    %c0_i32 = arith.constant 0 : i32
    %c0_i32_0 = arith.constant 0 : i32
    %c0_i32_1 = arith.constant 0 : i32
    return %c0_i32, %c0_i32_0 : i32, i32
  }
  func.func @transform_4(%arg0: i32) -> (i32, i32) {
    %c0_i32 = arith.constant 0 : i32
    %c0_i32_0 = arith.constant 0 : i32
    %c0_i32_1 = arith.constant 0 : i32
    return %c0_i32, %c0_i32_0 : i32, i32
  }
  func.func @transform_5(%arg0: i32) -> (i32, i32) {
    %c0_i32 = arith.constant 0 : i32
    %c0_i32_0 = arith.constant 0 : i32
    %c0_i32_1 = arith.constant 0 : i32
    return %c0_i32, %c0_i32_0 : i32, i32
  }
  func.func @transform_6(%arg0: i32) -> (i32, i32) {
    %c0_i32 = arith.constant 0 : i32
    %c0_i32_0 = arith.constant 0 : i32
    %c0_i32_1 = arith.constant 0 : i32
    return %c0_i32, %c0_i32_0 : i32, i32
  }
  func.func @transform_7(%arg0: i32) -> (i32, i32) {
    %c0_i32 = arith.constant 0 : i32
    %c0_i32_0 = arith.constant 0 : i32
    %c0_i32_1 = arith.constant 0 : i32
    return %c0_i32, %c0_i32_0 : i32, i32
  }
  func.func @transform_8(%arg0: i32) -> (i32, i32) {
    %c0_i32 = arith.constant 0 : i32
    %c0_i32_0 = arith.constant 0 : i32
    return %arg0, %c0_i32 : i32, i32
  }
}

</mosaic_0001>

<bundles_post_ra>
// kernel: tpu_custom_call.1
= control target key start
LH: loop header
LB: loop body
LE: loop exit
PB: predicated region body
PF: predicated region fallthrough
CT: control target
= control target key end

     0   :  { %s3373_s0 = inlined_call_operand.hbm [shape: f32[16,4096], index: 0, kind: input, shape index: {}]   ;;  %s3374_s1 = inlined_call_operand.vmem [shape: f32[4], index: 1, kind: input, shape index: {}]   ;;  %s3375_s2 = inlined_call_operand.vmem [shape: bf16[16,32], index: 2, kind: input, shape index: {}]   ;;  %s3376_s3 = inlined_call_operand.vmem [shape: f32[1,32], index: 3, kind: input, shape index: {}]   ;;  %s3377_s4 = inlined_call_operand.vmem [shape: bf16[32,16], index: 4, kind: input, shape index: {}]   ;;  %s3378_s5 = inlined_call_operand.vmem [shape: f32[1,16], index: 5, kind: input, shape index: {}]   ;;  %s3379_s6 = inlined_call_operand.vmem [shape: bf16[16,8], index: 6, kind: input, shape index: {}]   ;;  %s3380_s7 = inlined_call_operand.vmem [shape: f32[1,8], index: 7, kind: input, shape index: {}]   ;;  %s3381_s8 = inlined_call_operand.vmem [shape: f32[1024,8], index: 8, kind: output, shape index: {}]  }
   0x1   :  { %3383 = sst [smem:[#allocation10_spill]] %s3374_s1 }
   0x2   :  { %13 = vsyncpa [#allocation4], 0 }
   0x3   :  { %15 = vsyncpa [#allocation4 + $0x1], 0 }
   0x4   :  { %16 = vsyncpa [#allocation5], 0  ;;  %s2621_s27 = smov 0   ;;  %s2623_s28 = smov 0  }
   0x5   :  { %s2625_s29 = smov 0   ;;  %s2627_s30 = smov 0  }
   0x6 LB: > { %s3382_s9 = sadd.s32 4294967295, %s2570_s30   ;;  %s2641_s10 = sadd.s32 1, %s2570_s30   ;;  %s2570_s30 = sphi %s2627_s30, %s3395_s30   ;;  %s2566_s29 = sphi %s2625_s29, %s3394_s29   ;;  %s2562_s28 = sphi %s2623_s28, %s3393_s28   ;;  %s2558_s27 = sphi %s2621_s27, %s3392_s27  }
   0x7   : > { %s26_s11 = ssub.s32 %s2570_s30, %s2641_s10  ;;  %s29_s12 = sadd.s32 1, %s2566_s29 }
   0x8   : > { %p27_p0 = scmp.eq.s32.totalorder %s26_s11, 0  ;;  %p36_p1 = scmp.ne.s32.totalorder %s2566_s29, %s2562_s28 }
   0x9   : > { %p37_p2 = scmp.eq.s32.totalorder %s2570_s30, 0  ;;  %p42_p3 = scmp.ne.s32.totalorder %s2562_s28, %s2558_s27 }
   0xa   : > { %s2651_s13 = scalar_select %p27_p0, %s2566_s29, %s29_s12  }
   0xb   : > { %p38_p4 = por %p37_p2, %p36_p1  ;;  %p2655_p5 = scmp.eq.s32.totalorder %s3382_s9, 0 }
   0xc   : > { %3384 = sst [smem:[#allocation9_spill]] %s2651_s13  ;;  %p2291_p6 = scmp.ge.s32.totalorder %s2570_s30, 1 }
   0xd   : > { %p226_p7 = scmp.lt.s32.totalorder %s2570_s30, 5  ;;  %p2663_p8 = por %p2655_p5, %p42_p3 }
   0xe   : > { %s3388_s1 = sld [smem:[#allocation10_spill]]  ;;  %p2442_p11 = scmp.lt.s32.totalorder %s2570_s30, 4 }
   0xf   : > { %p2667_p9 = pnand %p2291_p6, %p226_p7  ;;  %s267_s20 = sand.u32 1, %s2566_s29  }
  0x10   : > { %p2680_p13 = pnand %p2442_p11, %p38_p4  ;;  %s2294_s22 = sshll.u32 %s267_s20, 7 }
  0x11   : > { %p2433_p10 = pneg %p2667_p9  ;;  %s2572_s23 = smov [#allocation6]  }
  0x12   : > { %s2419_s24 = sshll.u32 %s2570_s30, 6  ;;  %s271_s11 = scalar_lea.vmem [#allocation3], %s2294_s22 }
  0x13   : > { %p2434_p12 = pnand %p2433_p10, %p2655_p5  ;;  %s276_s27 = scalar_lea.hbm %s3373_s0, %s2419_s24 }
  0x14   : > { %s238_s19 = sshll.u32 %s3388_s1, 4  ;;  %s279_s12 = sshll.u32 %s271_s11, 4  ;;  %s239_s19 = int_to_ptr.vmem [resolvable:$true] %s238_s19  ;;  %s280_s12 = int_to_ptr.vmem [resolvable:$true] %s279_s12 }
  0x15   : > { %2436 = dma.vmem_to_smem (!%p2434_p12), %s239_s19, 16, %s2572_s23, [#allocation5]  }
  0x16   : > { %s277_s17 = sshll.u32 %s276_s27, 4  ;;  %s268_s18 = scalar_lea.sflag [#allocation4], %s267_s20  ;;  %s278_s17 = int_to_ptr.hbm [resolvable:$true] %s277_s17 }
  0x17   : > { %s2502_s9 = sshra.s32 %s278_s17, 4  ;;  %p2506_p1 = pneg %p2680_p13  ;;  %s2503_s9 = int_to_ptr.hbm [resolvable:$true] %s2502_s9 }
  0x18   : > { %s2504_s1 = scalar_lea.hbm %s2503_s9, 128  ;;  %s2509_s13 = scalar_lea.hbm %s3373_s0, 512 }
  0x19   : > { %p2505_p0 = scmp.ne.s32.totalorder %s2503_s9, %s2504_s1  ;;  %p2510_p4 = scmp.lt.s32.totalorder %s2503_s9, %s3373_s0 }
  0x1a   : > { %p2511_p6 = scmp.lt.s32.totalorder %s2509_s13, %s2504_s1 }
  0x1b   : > { %p2507_p2 = pnand %p2506_p1, %p2505_p0 }
  0x1c   : > { %p2512_p7 = por %p2511_p6, %p2510_p4 }
  0x1d   : > { %p2508_p3 = pneg %p2507_p2 }
  0x1f   : > { %p2513_p10 = pnand %p2512_p7, %p2508_p3 }
  0x21   : > { %2516 = shalt.err (!%p2513_p10)
}
  0x22   : > { %s2573_s20 = smov 4096   ;;  %s2574_s22 = smov 1024  }
  0x23   : > { %s2575_s26 = smov 64   ;;  %291 = sbr.rel (%p2667_p9) target bundleno = 1191 (0x4a7), region = 52 }
  0x24   : > { %2440 = dma.hbm_to_vmem [thread:$0]  (!%p2680_p13), %s278_s17, 2048, %s280_s12, %s268_s18, %s2573_s20, %s2574_s22, %s2575_s26  }
  0x25   : > { %s293_s27 = sand.u32 (!%p2667_p9), 1, %s2562_s28  }
  0x26   : > { %s2298_s11 = sshll.u32 (!%p2667_p9), %s293_s27, 7  ;;  %s294_s19 = scalar_lea.sflag (!%p2667_p9), [#allocation4], %s293_s27 }
  0x27   : > { %s2701_s23 = scalar_lea.vmem (!%p2667_p9), [#allocation3], %s2298_s11 }
  0x28   : > { %2549 = dma.done.wait (%p2663_p8), %s294_s19, 2048  }
  0x29   : > { %2551 = vsyncadd (%p2663_p8), %s294_s19, 4294965248 }
  0x2a   : > { %2553 = dma.done.wait (%p2655_p5), [#allocation5], 16  }
  0x2b   : > { %2555 = vsyncadd (%p2655_p5), [#allocation5], 4294967280 }
  0x2c   : > { %308 = sfence }
  0x2d   : > { %v345_v0 = vld [vmem:[%s2701_s23] sm:$0xff]  ;;  %v346_v1 = vld [vmem:[%s2701_s23 + $0x8] sm:$0xff]  ;;  %v347_v5 = vld [vmem:[%s2701_s23 + $0x10] sm:$0xff]  ;;  %vm473_vm0 = vcmask 130048   ;;  %vm995_vm1 = vcmask 261120   ;;  %s1124_s15 = sld [smem:[#allocation6]] }
  0x2e   : > { %v353_v2 = vld [vmem:[%s2701_s23 + $0x40] sm:$0xff]  ;;  %v354_v3 = vld [vmem:[%s2701_s23 + $0x48] sm:$0xff]  ;;  %v348_v6 = vld [vmem:[%s2701_s23 + $0x18] sm:$0xff]  ;;  %s2370_s16 = sld [smem:[#allocation6 + $0x1]]  ;;  %s3390_s11 = sadd.s32 4294967295, %s2570_s30  }
  0x2f   : > { %v361_v4 = vpack.c.bf16 %v353_v2, %v345_v0  ;;  %v362_v7 = vpack.c.bf16 %v354_v3, %v346_v1  ;;  %v355_v8 = vld [vmem:[%s2701_s23 + $0x50] sm:$0xff]  ;;  %v356_v9 = vld [vmem:[%s2701_s23 + $0x58] sm:$0xff]  ;;  %v2420_v12 = vld [vmem:[%s3375_s2] sm:$0xff]  ;;  %s2371_s17 = sld [smem:[#allocation6 + $0x2]]  ;;  %s2300_s19 = sshll.u32 %s3390_s11, 5 }
  0x30   : > { %v363_v10 = vpack.c.bf16 %v355_v8, %v347_v5  ;;  %v364_v11 = vpack.c.bf16 %v356_v9, %v348_v6  ;;  %673 = vmatpush.bf16.msra.mxu0 %v2420_v12  ;;  %2424 = vmatpush.bf16.msra.mxu1 %v2420_v12  ;;  %v349_v13 = vld [vmem:[%s2701_s23 + $0x20] sm:$0xff]  ;;  %v350_v14 = vld [vmem:[%s2701_s23 + $0x28] sm:$0xff]  ;;  %v351_v30 = vld [vmem:[%s2701_s23 + $0x30] sm:$0xff]  ;;  %s2372_s18 = sld [smem:[#allocation6 + $0x3]]  ;;  %p339_p5 = scmp.lt.s32.totalorder %s2300_s19, 127 }
  0x31   : > { %371 = vxpose.binary.xlu0.c.b16.start.end [1/2] (short) %v362_v7, %v361_v4, 128  ;;  %v357_v15 = vld [vmem:[%s2701_s23 + $0x60] sm:$0xff]  ;;  %v358_v16 = vld [vmem:[%s2701_s23 + $0x68] sm:$0xff]  ;;  %v352_v31 = vld [vmem:[%s2701_s23 + $0x38] sm:$0xff] }
  0x32   : > { %395 = vxpose.binary.xlu1.c.b16.start.end [1/2] (short) %v364_v11, %v363_v10, 128  ;;  %v365_v17 = vpack.c.bf16 %v357_v15, %v349_v13  ;;  %v366_v18 = vpack.c.bf16 %v358_v16, %v350_v14  ;;  %v359_v32 = vld [vmem:[%s2701_s23 + $0x70] sm:$0xff]  ;;  %v360_v33 = vld [vmem:[%s2701_s23 + $0x78] sm:$0xff]  ;;  %v2422_v3 = vld [vmem:[%s3377_s4 + $0x8] sm:$0xff]  ;;  %s3397_s19 = smov (!%p339_p5, %s2300_s19), 127 }
  0x33   : > { %2425 = vmatpush.bf16.msra.mxu2 %v2420_v12  ;;  %2426 = vmatpush.bf16.msra.mxu3 %v2420_v12  ;;  %v367_v34 = vpack.c.bf16 %v359_v32, %v351_v30  ;;  %v368_v36 = vpack.c.bf16 %v360_v33, %v352_v31  ;;  %v2421_v7 = vld [vmem:[%s3377_s4] sm:$0xff]  ;;  %v2798_v11 = vstv %s1124_s15  ;;  %s2301_s30 = sshll.u32 %s3397_s19, 3 }
  0x34   : > { %1833 = vmatpush.bf16.msrb.mxu1 %v2422_v3  ;;  %v2800_v13 = vstv %s2370_s16  ;;  %s3058_s14 = scalar_lea.vmem %s3381_s8, %s2301_s30 }
  0x38   : > { %1834 = vmatpush.bf16.msrb.mxu1 %v2421_v7 }
  0xb1   : > { %419 = vxpose.binary.xlu0.c.b16.start.end [1/2] (short) %v366_v18, %v365_v17, 128 }
  0xb2   : > { %443 = vxpose.binary.xlu1.c.b16.start.end [1/2] (short) %v368_v36, %v367_v34, 128 }
  0xdd   : > { %v379_v19 = vpop.trf.xlu0 }
  0xde   : > { %2306 = vmatmul.msk.bf16.vlgmr.msra.gmra.mxu0 %vm473_vm0, %v379_v19  ;;  %v2729_v24 = vpop.trf.xlu1  ;;  %v2808_v19 = vstv %s2371_s17 }
  0xe5   : > { %v380_v20 = vpop.trf.xlu0 }
  0xe6   : > { %v404_v26 = vpop.trf.xlu1 }
  0xe7   : > { %2330 = vmatmul.msk.bf16.vlgmr.msra.gmra.mxu1 %vm473_vm0, %v404_v26  ;;  %v2813_v26 = vstv %s2372_s18 }
  0xed   : > { %v381_v21 = vpop.trf.xlu0 }
  0xee   : > { %2307 = vmatmul.msk.bf16.gmra.mxu0 %vm473_vm0, %v381_v21  ;;  %v2735_v28 = vpop.trf.xlu1 }
  0xf5   : > { %v382_v22 = vpop.trf.xlu0 }
  0xf6   : > { %v406_v35 = vpop.trf.xlu1 }
  0xf7   : > { %2331 = vmatmul.msk.bf16.gmra.mxu1 %vm473_vm0, %v406_v35 }
  0xfd   : > { %v383_v23 = vpop.trf.xlu0 }
  0xfe   : > { %2308 = vmatmul.msk.bf16.gmra.mxu0 %vm473_vm0, %v383_v23  ;;  %v2745_v38 = vpop.trf.xlu1 }
 0x105   : > { %v2731_v25 = vpop.trf.xlu0 }
 0x106   : > { %v408_v40 = vpop.trf.xlu1 }
 0x107   : > { %2332 = vmatmul.msk.bf16.gmra.mxu1 %vm473_vm0, %v408_v40 }
 0x10d   : > { %v385_v27 = vpop.trf.xlu0 }
 0x10e   : > { %2309 = vmatmul.msk.bf16.gmra.mxu0 %vm473_vm0, %v385_v27  ;;  %v2751_v42 = vpop.trf.xlu1 }
 0x115   : > { %v2737_v29 = vpop.trf.xlu0 }
 0x116   : > { %v410_v44 = vpop.trf.xlu1 }
 0x117   : > { %2333 = vmatmul.msk.bf16.gmra.mxu1 %vm473_vm0, %v410_v44 }
 0x11d   : > { %v387_v37 = vpop.trf.xlu0 }
 0x11e   : > { %2310 = vmatmul.msk.bf16.gmra.mxu0 %vm473_vm0, %v387_v37  ;;  %v2757_v46 = vpop.trf.xlu1  ;;  %v2823_v37 = vld [vmem:[%s3376_s3] ss:$0 sm:$0xff] }
 0x125   : > { %v2747_v39 = vpop.trf.xlu0 }
 0x126   : > { %v412_v48 = vpop.trf.xlu1 }
 0x127   : > { %2334 = vmatmul.msk.bf16.gmra.mxu1 %vm473_vm0, %v412_v48 }
 0x12d   : > { %v389_v41 = vpop.trf.xlu0 }
 0x12e   : > { %2311 = vmatmul.msk.bf16.gmra.mxu0 %vm473_vm0, %v389_v41  ;;  %v2763_v50 = vpop.trf.xlu1 }
 0x135   : > { %v2753_v43 = vpop.trf.xlu0 }
 0x136   : > { %v414_v52 = vpop.trf.xlu1 }
 0x137   : > { %2335 = vmatmul.msk.bf16.gmra.mxu1 %vm473_vm0, %v414_v52 }
 0x13d   : > { %v391_v45 = vpop.trf.xlu0 }
 0x13e   : > { %2312 = vmatmul.msk.bf16.gmra.mxu0 %vm473_vm0, %v391_v45  ;;  %v2771_v55 = vpop.trf.xlu1 }
 0x145   : > { %v2759_v47 = vpop.trf.xlu0 }
 0x146   : > { %v416_v58 = vpop.trf.xlu1 }
 0x147   : > { %2336 = vmatmul.msk.bf16.gmra.mxu1 %vm473_vm0, %v416_v58 }
 0x14d   : > { %v393_v49 = vpop.trf.xlu0 }
 0x14e   : > { %2313 = vmatmul.msk.bf16.gmra.mxu0 %vm473_vm0, %v393_v49  ;;  %v2779_v61 = vpop.trf.xlu1 }
 0x155   : > { %v2765_v51 = vpop.trf.xlu0 }
 0x156   : > { %v418_v0 = vpop.trf.xlu1 }
 0x157   : > { %2337 = vmatmul.msk.bf16.gmra.mxu1 %vm473_vm0, %v418_v0 }
 0x15b   : > { %v675_v53 = vpop.f32.mrf.mxu0 }
 0x15c   : > { %996 = vst.msk [vmem:[#allocation2] sm:$0xff] %vm995_vm1, %v675_v53 }
 0x15d   : > { %v427_v54 = vpop.trf.xlu0 }
 0x15e   : > { %2314 = vmatmul.msk.bf16.gmra.mxu0 %vm473_vm0, %v380_v20  ;;  %2338 = vmatmul.msk.bf16.vlgmr.msra.gmra.mxu2 %vm473_vm0, %v427_v54 }
 0x163   : > { %v677_v56 = vpop.f32.mrf.mxu0 }
 0x164   : > { %997 = vst.msk [vmem:[#allocation2 + $0x8] sm:$0xff] %vm995_vm1, %v677_v56  ;;  %v795_v6 = vpop.f32.mrf.mxu1 }
 0x165   : > { %v428_v57 = vpop.trf.xlu0  ;;  %1044 = vst.msk [vmem:[#allocation2 + $0x180] sm:$0xff] %vm995_vm1, %v795_v6 }
 0x166   : > { %2346 = vmatmul.msk.bf16.vlgmr.msra.gmra.mxu3 %vm473_vm0, %v428_v57 }
 0x16b   : > { %v680_v59 = vpop.f32.mrf.mxu0 }
 0x16c   : > { %998 = vst.msk [vmem:[#allocation2 + $0x10] sm:$0xff] %vm995_vm1, %v680_v59  ;;  %v797_v14 = vpop.f32.mrf.mxu1 }
 0x16d   : > { %v429_v60 = vpop.trf.xlu0  ;;  %1045 = vst.msk [vmem:[#allocation2 + $0x188] sm:$0xff] %vm995_vm1, %v797_v14 }
 0x16e   : > { %2315 = vmatmul.msk.bf16.gmra.mxu0 %vm473_vm0, %v382_v22  ;;  %2339 = vmatmul.msk.bf16.gmra.mxu2 %vm473_vm0, %v429_v60 }
 0x173   : > { %v682_v62 = vpop.f32.mrf.mxu0 }
 0x174   : > { %999 = vst.msk [vmem:[#allocation2 + $0x18] sm:$0xff] %vm995_vm1, %v682_v62  ;;  %v800_v23 = vpop.f32.mrf.mxu1 }
 0x175   : > { %v430_v63 = vpop.trf.xlu0  ;;  %1046 = vst.msk [vmem:[#allocation2 + $0x190] sm:$0xff] %vm995_vm1, %v800_v23 }
 0x176   : > { %2347 = vmatmul.msk.bf16.gmra.mxu3 %vm473_vm0, %v430_v63 }
 0x17b   : > { %v685_v1 = vpop.f32.mrf.mxu0  ;;  %v1125_v10 = vld [vmem:[#allocation2] ss:$4 sm:$0xff]  ;;  %v1223_v12 = vld [vmem:[#allocation2 + $0x1] ss:$4 sm:$0xff]  ;;  %v1353_v18 = vld [vmem:[#allocation2 + $0x2] ss:$4 sm:$0xff] }
 0x17c   : > { %1000 = vst.msk [vmem:[#allocation2 + $0x20] sm:$0xff] %vm995_vm1, %v685_v1  ;;  %v1189_v15 = vmul.f32 %v2798_v11, %v1125_v10  ;;  %v1287_v16 = vmul.f32 %v2800_v13, %v1223_v12  ;;  %v1417_v22 = vmul.f32 %v2808_v19, %v1353_v18  ;;  %v802_v48 = vpop.f32.mrf.mxu1  ;;  %v451_v12 = vpop.trf.xlu1 }
 0x17d   : > { %v431_v2 = vpop.trf.xlu0  ;;  %1047 = vst.msk [vmem:[#allocation2 + $0x198] sm:$0xff] %vm995_vm1, %v802_v48 }
 0x17e   : > { %2316 = vmatmul.msk.bf16.gmra.mxu0 %vm473_vm0, %v2731_v25  ;;  %2340 = vmatmul.msk.bf16.gmra.mxu2 %vm473_vm0, %v431_v2  ;;  %v1319_v20 = vadd.f32 %v1287_v16, %v1189_v15  ;;  %v1483_v25 = vld [vmem:[#allocation2 + $0x3] ss:$4 sm:$0xff] }
 0x180   : > { %v1449_v27 = vadd.f32 %v1417_v22, %v1319_v20 }
 0x183   : > { %v687_v4 = vpop.f32.mrf.mxu0 }
 0x184   : > { %1001 = vst.msk [vmem:[#allocation2 + $0x28] sm:$0xff] %vm995_vm1, %v687_v4  ;;  %v805_v60 = vpop.f32.mrf.mxu1  ;;  %v2860_v22 = vpop.trf.xlu1 }
 0x185   : > { %v432_v5 = vpop.trf.xlu0  ;;  %1048 = vst.msk [vmem:[#allocation2 + $0x1a0] sm:$0xff] %vm995_vm1, %v805_v60 }
 0x186   : > { %2348 = vmatmul.msk.bf16.gmra.mxu3 %vm473_vm0, %v432_v5 }
 0x18b   : > { %v690_v8 = vpop.f32.mrf.mxu0 }
 0x18c   : > { %1002 = vst.msk [vmem:[#allocation2 + $0x30] sm:$0xff] %vm995_vm1, %v690_v8  ;;  %v807_v3 = vpop.f32.mrf.mxu1 }
 0x18d   : > { %v433_v9 = vpop.trf.xlu0  ;;  %1049 = vst.msk [vmem:[#allocation2 + $0x1a8] sm:$0xff] %vm995_vm1, %v807_v3 }
 0x18e   : > { %2317 = vmatmul.msk.bf16.gmra.mxu0 %vm473_vm0, %v2737_v29  ;;  %2341 = vmatmul.msk.bf16.gmra.mxu2 %vm473_vm0, %v433_v9  ;;  %v1547_v29 = vmul.f32 %v2813_v26, %v1483_v25 }
 0x190   : > { %v1579_v36 = vadd.f32 %v1547_v29, %v1449_v27 }
 0x192   : > { %v1615_v53 = vadd.f32 %v2823_v37, %v1579_v36 }
 0x193   : > { %v692_v17 = vpop.f32.mrf.mxu0 }
 0x194   : > { %1003 = vst.msk [vmem:[#allocation2 + $0x38] sm:$0xff] %vm995_vm1, %v692_v17  ;;  %vm1647_vm2 = vcmp.gt.f32.partialorder %v1615_v53, 0.0  ;;  %v810_v6 = vpop.f32.mrf.mxu1 }
 0x195   : > { %v434_v21 = vpop.trf.xlu0  ;;  %1050 = vst.msk [vmem:[#allocation2 + $0x1b0] sm:$0xff] %vm995_vm1, %v810_v6 }
 0x196   : > { %2349 = vmatmul.msk.bf16.gmra.mxu3 %vm473_vm0, %v434_v21 }
 0x19b   : > { %v695_v30 = vpop.f32.mrf.mxu0  ;;  %v1127_v31 = vld [vmem:[#allocation2 + $0x20] ss:$4 sm:$0xff]  ;;  %v1225_v32 = vld [vmem:[#allocation2 + $0x21] ss:$4 sm:$0xff]  ;;  %v1355_v33 = vld [vmem:[#allocation2 + $0x22] ss:$4 sm:$0xff] }
 0x19c   : > { %1004 = vst.msk [vmem:[#allocation2 + $0x40] sm:$0xff] %vm995_vm1, %v695_v30  ;;  %v1190_v34 = vmul.f32 %v2798_v11, %v1127_v31  ;;  %v1288_v35 = vmul.f32 %v2800_v13, %v1225_v32  ;;  %v1485_v41 = vld [vmem:[#allocation2 + $0x23] ss:$4 sm:$0xff]  ;;  %v1418_v45 = vmul.f32 %v2808_v19, %v1355_v33 }
 0x19d   : > { %v435_v40 = vpop.trf.xlu0  ;;  %v1548_v52 = vmul.f32 %v2813_v26, %v1485_v41 }
 0x19e   : > { %2318 = vmatmul.msk.bf16.gmra.mxu0 %vm473_vm0, %v2747_v39  ;;  %2342 = vmatmul.msk.bf16.gmra.mxu2 %vm473_vm0, %v435_v40  ;;  %v1320_v44 = vadd.f32 %v1288_v35, %v1190_v34  ;;  %v1679_v39 = vmul.f32 0.01, %v1615_v53  ;;  %v453_v34 = vpop.trf.xlu1 }
 0x1a0   : > { %v1450_v49 = vadd.f32 %v1418_v45, %v1320_v44  ;;  %v1711_v62 = vsel %vm1647_vm2, %v1615_v53, %v1679_v39 }
 0x1a2   : > { %v1580_v54 = vadd.f32 %v1548_v52, %v1450_v49 }
 0x1a3   : > { %v697_v56 = vpop.f32.mrf.mxu0 }
 0x1a4   : > { %1005 = vst.msk [vmem:[#allocation2 + $0x48] sm:$0xff] %vm995_vm1, %v697_v56  ;;  %v1616_v57 = vadd.f32 %v2823_v37, %v1580_v54 }
 0x1a5   : > { %v436_v58 = vpop.trf.xlu0 }
 0x1a6   : > { %2350 = vmatmul.msk.bf16.gmra.mxu3 %vm473_vm0, %v436_v58  ;;  %vm1648_vm3 = vcmp.gt.f32.partialorder %v1616_v57, 0.0  ;;  %v1680_v59 = vmul.f32 0.01, %v1616_v57 }
 0x1a8   : > { %v1712_v63 = vsel %vm1648_vm3, %v1616_v57, %v1680_v59 }
 0x1a9   : > { %v1743_v0 = vpack.c.bf16 %v1712_v63, %v1711_v62  ;;  %v2879_v63 = vpop.trf.xlu1 }
 0x1ab   : > { %v700_v1 = vpop.f32.mrf.mxu0  ;;  %2381 = vmatmul.msk.bf16.vlgmr.msrb.gmra.mxu1 %vm995_vm1, %v1743_v0 }
 0x1ac   : > { %1006 = vst.msk [vmem:[#allocation2 + $0x50] sm:$0xff] %vm995_vm1, %v700_v1 }
 0x1ad   : > { %v437_v2 = vpop.trf.xlu0 }
 0x1ae   : > { %2319 = vmatmul.msk.bf16.gmra.mxu0 %vm473_vm0, %v2753_v43  ;;  %2343 = vmatmul.msk.bf16.gmra.mxu2 %vm473_vm0, %v437_v2  ;;  %v812_v43 = vpop.f32.mrf.mxu1 }
 0x1af   : > { %1051 = vst.msk [vmem:[#allocation2 + $0x1b8] sm:$0xff] %vm995_vm1, %v812_v43 }
 0x1b3   : > { %v702_v4 = vpop.f32.mrf.mxu0 }
 0x1b4   : > { %1007 = vst.msk [vmem:[#allocation2 + $0x58] sm:$0xff] %vm995_vm1, %v702_v4 }
 0x1b5   : > { %v438_v5 = vpop.trf.xlu0 }
 0x1b6   : > { %2351 = vmatmul.msk.bf16.gmra.mxu3 %vm473_vm0, %v438_v5  ;;  %v815_v14 = vpop.f32.mrf.mxu1 }
 0x1b7   : > { %1052 = vst.msk [vmem:[#allocation2 + $0x1c0] sm:$0xff] %vm995_vm1, %v815_v14 }
 0x1bb   : > { %v705_v7 = vpop.f32.mrf.mxu0  ;;  %v1227_v17 = vld [vmem:[#allocation2 + $0x41] ss:$4 sm:$0xff]  ;;  %v1357_v25 = vld [vmem:[#allocation2 + $0x42] ss:$4 sm:$0xff]  ;;  %v1487_v31 = vld [vmem:[#allocation2 + $0x43] ss:$4 sm:$0xff] }
 0x1bc   : > { %1008 = vst.msk [vmem:[#allocation2 + $0x60] sm:$0xff] %vm995_vm1, %v705_v7  ;;  %v1289_v21 = vmul.f32 %v2800_v13, %v1227_v17  ;;  %v1549_v33 = vmul.f32 %v2813_v26, %v1487_v31 }
 0x1bd   : > { %v439_v8 = vpop.trf.xlu0 }
 0x1be   : > { %2320 = vmatmul.msk.bf16.gmra.mxu0 %vm473_vm0, %v2759_v47  ;;  %2344 = vmatmul.msk.bf16.gmra.mxu2 %vm473_vm0, %v439_v8  ;;  %v1129_v47 = vld [vmem:[#allocation2 + $0x40] ss:$4 sm:$0xff]  ;;  %v817_v18 = vpop.f32.mrf.mxu1  ;;  %v455_v8 = vpop.trf.xlu1 }
 0x1bf   : > { %1053 = vst.msk [vmem:[#allocation2 + $0x1c8] sm:$0xff] %vm995_vm1, %v817_v18  ;;  %v1191_v20 = vmul.f32 %v2798_v11, %v1129_v47 }
 0x1c1   : > { %v1321_v27 = vadd.f32 %v1289_v21, %v1191_v20 }
 0x1c3   : > { %v707_v9 = vpop.f32.mrf.mxu0 }
 0x1c4   : > { %1009 = vst.msk [vmem:[#allocation2 + $0x68] sm:$0xff] %vm995_vm1, %v707_v9 }
 0x1c5   : > { %v440_v10 = vpop.trf.xlu0 }
 0x1c6   : > { %2352 = vmatmul.msk.bf16.gmra.mxu3 %vm473_vm0, %v440_v10  ;;  %v820_v30 = vpop.f32.mrf.mxu1 }
 0x1c7   : > { %1054 = vst.msk [vmem:[#allocation2 + $0x1d0] sm:$0xff] %vm995_vm1, %v820_v30 }
 0x1cb   : > { %v710_v15 = vpop.f32.mrf.mxu0 }
 0x1cc   : > { %1010 = vst.msk [vmem:[#allocation2 + $0x70] sm:$0xff] %vm995_vm1, %v710_v15  ;;  %v2895_v15 = vpop.trf.xlu1 }
 0x1cd   : > { %v441_v16 = vpop.trf.xlu0 }
 0x1ce   : > { %2321 = vmatmul.msk.bf16.gmra.mxu0 %vm473_vm0, %v2765_v51  ;;  %2345 = vmatmul.msk.bf16.gmra.mxu2 %vm473_vm0, %v441_v16  ;;  %v1419_v51 = vmul.f32 %v2808_v19, %v1357_v25  ;;  %v822_v54 = vpop.f32.mrf.mxu1 }
 0x1cf   : > { %1055 = vst.msk [vmem:[#allocation2 + $0x1d8] sm:$0xff] %vm995_vm1, %v822_v54 }
 0x1d0   : > { %v1451_v32 = vadd.f32 %v1419_v51, %v1321_v27 }
 0x1d2   : > { %v1581_v48 = vadd.f32 %v1549_v33, %v1451_v32 }
 0x1d3   : > { %v712_v23 = vpop.f32.mrf.mxu0 }
 0x1d4   : > { %1011 = vst.msk [vmem:[#allocation2 + $0x78] sm:$0xff] %vm995_vm1, %v712_v23  ;;  %v1617_v39 = vadd.f32 %v2823_v37, %v1581_v48  ;;  %v457_v21 = vpop.trf.xlu1 }
 0x1d5   : > { %v442_v29 = vpop.trf.xlu0 }
 0x1d6   : > { %2353 = vmatmul.msk.bf16.gmra.mxu3 %vm473_vm0, %v442_v29  ;;  %v1681_v62 = vmul.f32 0.01, %v1617_v39  ;;  %vm1649_vm4 = vcmp.gt.f32.partialorder %v1617_v39, 0.0  ;;  %v825_v1 = vpop.f32.mrf.mxu1 }
 0x1d7   : > { %1056 = vst.msk [vmem:[#allocation2 + $0x1e0] sm:$0xff] %vm995_vm1, %v825_v1 }
 0x1d8   : > { %v1713_v2 = vsel %vm1649_vm4, %v1617_v39, %v1681_v62  ;;  %vm2177_vm4 = vcmask 64512  }
 0x1db   : > { %v715_v35 = vpop.f32.mrf.mxu0  ;;  %v1131_v36 = vld [vmem:[#allocation2 + $0x60] ss:$4 sm:$0xff]  ;;  %v1229_v40 = vld [vmem:[#allocation2 + $0x61] ss:$4 sm:$0xff]  ;;  %v1359_v41 = vld [vmem:[#allocation2 + $0x62] ss:$4 sm:$0xff] }
 0x1dc   : > { %1012 = vst.msk [vmem:[#allocation2 + $0x80] sm:$0xff] %vm995_vm1, %v715_v35  ;;  %v1192_v44 = vmul.f32 %v2798_v11, %v1131_v36  ;;  %v1290_v45 = vmul.f32 %v2800_v13, %v1229_v40  ;;  %v1489_v49 = vld [vmem:[#allocation2 + $0x63] ss:$4 sm:$0xff]  ;;  %v1420_v53 = vmul.f32 %v2808_v19, %v1359_v41  ;;  %v2910_v29 = vpop.trf.xlu1 }
 0x1dd   : > { %v1550_v57 = vmul.f32 %v2813_v26, %v1489_v49  ;;  %v2423_v41 = vld [vmem:[%s3379_s6] sm:$0xff] }
 0x1de   : > { %2322 = vmatmul.msk.bf16.gmra.mxu0 %vm473_vm0, %v2729_v24  ;;  %v1322_v52 = vadd.f32 %v1290_v45, %v1192_v44  ;;  %v827_v43 = vpop.f32.mrf.mxu1  ;;  %2095 = vmatpush.bf16.msrb.mxu2 %v2423_v41 }
 0x1df   : > { %1057 = vst.msk [vmem:[#allocation2 + $0x1e8] sm:$0xff] %vm995_vm1, %v827_v43 }
 0x1e0   : > { %v1452_v56 = vadd.f32 %v1420_v53, %v1322_v52 }
 0x1e1   : > { %v835_v58 = vpop.f32.mrf.mxu2 }
 0x1e2   : > { %1060 = vst.msk [vmem:[#allocation2 + $0x200] sm:$0xff] %vm995_vm1, %v835_v58  ;;  %v1582_v59 = vadd.f32 %v1550_v57, %v1452_v56 }
 0x1e3   : > { %v717_v60 = vpop.f32.mrf.mxu0 }
 0x1e4   : > { %1013 = vst.msk [vmem:[#allocation2 + $0x88] sm:$0xff] %vm995_vm1, %v717_v60  ;;  %v1618_v24 = vadd.f32 %v2823_v37, %v1582_v59 }
 0x1e6   : > { %2354 = vmatmul.msk.bf16.gmra.mxu3 %vm473_vm0, %v451_v12  ;;  %vm1650_vm5 = vcmp.gt.f32.partialorder %v1618_v24, 0.0  ;;  %v1682_v0 = vmul.f32 0.01, %v1618_v24  ;;  %v830_v14 = vpop.f32.mrf.mxu1 }
 0x1e7   : > { %1058 = vst.msk [vmem:[#allocation2 + $0x1f0] sm:$0xff] %vm995_vm1, %v830_v14 }
 0x1e8   : > { %v1714_v3 = vsel %vm1650_vm5, %v1618_v24, %v1682_v0 }
 0x1e9   : > { %v837_v4 = vpop.f32.mrf.mxu2  ;;  %v875_v5 = vpop.f32.mrf.mxu3  ;;  %v1744_v6 = vpack.c.bf16 %v1714_v3, %v1713_v2 }
 0x1ea   : > { %1061 = vst.msk [vmem:[#allocation2 + $0x208] sm:$0xff] %vm995_vm1, %v837_v4 }
 0x1eb   : > { %1076 = vst.msk [vmem:[#allocation2 + $0x280] sm:$0xff] %vm995_vm1, %v875_v5  ;;  %v720_v7 = vpop.f32.mrf.mxu0  ;;  %2382 = vmatmul.msk.bf16.gmra.mxu1 %vm995_vm1, %v1744_v6 }
 0x1ec   : > { %1014 = vst.msk [vmem:[#allocation2 + $0x90] sm:$0xff] %vm995_vm1, %v720_v7 }
 0x1ee   : > { %2323 = vmatmul.msk.bf16.gmra.mxu0 %vm473_vm0, %v2735_v28  ;;  %v832_v17 = vpop.f32.mrf.mxu1 }
 0x1ef   : > { %1059 = vst.msk [vmem:[#allocation2 + $0x1f8] sm:$0xff] %vm995_vm1, %v832_v17 }
 0x1f1   : > { %v840_v9 = vpop.f32.mrf.mxu2  ;;  %v877_v10 = vpop.f32.mrf.mxu3 }
 0x1f2   : > { %1062 = vst.msk [vmem:[#allocation2 + $0x210] sm:$0xff] %vm995_vm1, %v840_v9 }
 0x1f3   : > { %1077 = vst.msk [vmem:[#allocation2 + $0x288] sm:$0xff] %vm995_vm1, %v877_v10  ;;  %v722_v12 = vpop.f32.mrf.mxu0 }
 0x1f4   : > { %1015 = vst.msk [vmem:[#allocation2 + $0x98] sm:$0xff] %vm995_vm1, %v722_v12 }
 0x1f6   : > { %2355 = vmatmul.msk.bf16.gmra.mxu3 %vm473_vm0, %v453_v34 }
 0x1f9   : > { %v842_v28 = vpop.f32.mrf.mxu2  ;;  %v880_v16 = vpop.f32.mrf.mxu3 }
 0x1fa   : > { %1063 = vst.msk [vmem:[#allocation2 + $0x218] sm:$0xff] %vm995_vm1, %v842_v28  ;;  %v2945_v28 = vld [vmem:[%s3378_s5] ss:$0 sm:$0xff] }
 0x1fb   : > { %1078 = vst.msk [vmem:[#allocation2 + $0x290] sm:$0xff] %vm995_vm1, %v880_v16  ;;  %v725_v47 = vpop.f32.mrf.mxu0  ;;  %v1133_v51 = vld [vmem:[#allocation2 + $0x80] ss:$4 sm:$0xff]  ;;  %v1231_v30 = vld [vmem:[#allocation2 + $0x81] ss:$4 sm:$0xff] }
 0x1fc   : > { %1016 = vst.msk [vmem:[#allocation2 + $0xa0] sm:$0xff] %vm995_vm1, %v725_v47  ;;  %v1193_v31 = vmul.f32 %v2798_v11, %v1133_v51  ;;  %v1291_v32 = vmul.f32 %v2800_v13, %v1231_v30  ;;  %v1361_v36 = vld [vmem:[#allocation2 + $0x82] ss:$4 sm:$0xff]  ;;  %v1491_v45 = vld [vmem:[#allocation2 + $0x83] ss:$4 sm:$0xff] }
 0x1fd   : > { %v1421_v44 = vmul.f32 %v2808_v19, %v1361_v36  ;;  %v1551_v53 = vmul.f32 %v2813_v26, %v1491_v45 }
 0x1fe   : > { %2324 = vmatmul.msk.bf16.gmra.mxu0 %vm473_vm0, %v2745_v38  ;;  %v1323_v40 = vadd.f32 %v1291_v32, %v1193_v31 }
 0x200   : > { %v1453_v48 = vadd.f32 %v1421_v44, %v1323_v40 }
 0x201   : > { %v845_v18 = vpop.f32.mrf.mxu2  ;;  %v882_v20 = vpop.f32.mrf.mxu3 }
 0x202   : > { %1064 = vst.msk [vmem:[#allocation2 + $0x220] sm:$0xff] %vm995_vm1, %v845_v18  ;;  %v1583_v60 = vadd.f32 %v1551_v53, %v1453_v48 }
 0x203   : > { %1079 = vst.msk [vmem:[#allocation2 + $0x298] sm:$0xff] %vm995_vm1, %v882_v20  ;;  %v727_v23 = vpop.f32.mrf.mxu0 }
 0x204   : > { %1017 = vst.msk [vmem:[#allocation2 + $0xa8] sm:$0xff] %vm995_vm1, %v727_v23  ;;  %v1619_v3 = vadd.f32 %v2823_v37, %v1583_v60 }
 0x206   : > { %2356 = vmatmul.msk.bf16.gmra.mxu3 %vm473_vm0, %v455_v8  ;;  %v1683_v43 = vmul.f32 0.01, %v1619_v3  ;;  %vm1651_vm6 = vcmp.gt.f32.partialorder %v1619_v3, 0.0 }
 0x208   : > { %v1715_v12 = vsel %vm1651_vm6, %v1619_v3, %v1683_v43 }
 0x209   : > { %v847_v25 = vpop.f32.mrf.mxu2  ;;  %v885_v27 = vpop.f32.mrf.mxu3 }
 0x20a   : > { %1065 = vst.msk [vmem:[#allocation2 + $0x228] sm:$0xff] %vm995_vm1, %v847_v25 }
 0x20b   : > { %1080 = vst.msk [vmem:[#allocation2 + $0x2a0] sm:$0xff] %vm995_vm1, %v885_v27  ;;  %v730_v38 = vpop.f32.mrf.mxu0 }
 0x20c   : > { %1018 = vst.msk [vmem:[#allocation2 + $0xb0] sm:$0xff] %vm995_vm1, %v730_v38 }
 0x20e   : > { %2325 = vmatmul.msk.bf16.gmra.mxu0 %vm473_vm0, %v2751_v42  ;;  %v459_v42 = vpop.trf.xlu1 }
 0x211   : > { %v850_v33 = vpop.f32.mrf.mxu2  ;;  %v887_v34 = vpop.f32.mrf.mxu3 }
 0x212   : > { %1066 = vst.msk [vmem:[#allocation2 + $0x230] sm:$0xff] %vm995_vm1, %v850_v33 }
 0x213   : > { %1081 = vst.msk [vmem:[#allocation2 + $0x2a8] sm:$0xff] %vm995_vm1, %v887_v34  ;;  %v732_v35 = vpop.f32.mrf.mxu0 }
 0x214   : > { %1019 = vst.msk [vmem:[#allocation2 + $0xb8] sm:$0xff] %vm995_vm1, %v732_v35 }
 0x216   : > { %2357 = vmatmul.msk.bf16.gmra.mxu3 %vm473_vm0, %v457_v21  ;;  %v2935_v4 = vpop.trf.xlu1 }
 0x219   : > { %v852_v49 = vpop.f32.mrf.mxu2  ;;  %v890_v52 = vpop.f32.mrf.mxu3 }
 0x21a   : > { %1067 = vst.msk [vmem:[#allocation2 + $0x238] sm:$0xff] %vm995_vm1, %v852_v49 }
 0x21b   : > { %1082 = vst.msk [vmem:[#allocation2 + $0x2b0] sm:$0xff] %vm995_vm1, %v890_v52  ;;  %v735_v54 = vpop.f32.mrf.mxu0  ;;  %v1135_v56 = vld [vmem:[#allocation2 + $0xa0] ss:$4 sm:$0xff]  ;;  %v1233_v57 = vld [vmem:[#allocation2 + $0xa1] ss:$4 sm:$0xff] }
 0x21c   : > { %1020 = vst.msk [vmem:[#allocation2 + $0xc0] sm:$0xff] %vm995_vm1, %v735_v54  ;;  %v1194_v39 = vmul.f32 %v2798_v11, %v1135_v56  ;;  %v1292_v58 = vmul.f32 %v2800_v13, %v1233_v57  ;;  %v1363_v59 = vld [vmem:[#allocation2 + $0xa2] ss:$4 sm:$0xff]  ;;  %v1493_v24 = vld [vmem:[#allocation2 + $0xa3] ss:$4 sm:$0xff] }
 0x21d   : > { %v1422_v0 = vmul.f32 %v2808_v19, %v1363_v59  ;;  %v1552_v2 = vmul.f32 %v2813_v26, %v1493_v24 }
 0x21e   : > { %2326 = vmatmul.msk.bf16.gmra.mxu0 %vm473_vm0, %v2757_v46  ;;  %v1324_v62 = vadd.f32 %v1292_v58, %v1194_v39  ;;  %v461_v18 = vpop.trf.xlu1 }
 0x220   : > { %v1454_v1 = vadd.f32 %v1422_v0, %v1324_v62 }
 0x221   : > { %v855_v5 = vpop.f32.mrf.mxu2  ;;  %v892_v6 = vpop.f32.mrf.mxu3 }
 0x222   : > { %1068 = vst.msk [vmem:[#allocation2 + $0x240] sm:$0xff] %vm995_vm1, %v855_v5  ;;  %v1584_v7 = vadd.f32 %v1552_v2, %v1454_v1 }
 0x223   : > { %1083 = vst.msk [vmem:[#allocation2 + $0x2b8] sm:$0xff] %vm995_vm1, %v892_v6  ;;  %v737_v8 = vpop.f32.mrf.mxu0 }
 0x224   : > { %1021 = vst.msk [vmem:[#allocation2 + $0xc8] sm:$0xff] %vm995_vm1, %v737_v8  ;;  %v1620_v46 = vadd.f32 %v2823_v37, %v1584_v7 }
 0x226   : > { %2358 = vmatmul.msk.bf16.gmra.mxu3 %vm473_vm0, %v459_v42  ;;  %vm1652_vm7 = vcmp.gt.f32.partialorder %v1620_v46, 0.0  ;;  %v1684_v9 = vmul.f32 0.01, %v1620_v46  ;;  %v2958_v32 = vpop.trf.xlu1 }
 0x228   : > { %v1836_v10 = vpop.f32.mrf.mxu1  ;;  %v1716_v14 = vsel %vm1652_vm7, %v1620_v46, %v1684_v9 }
 0x229   : > { %v857_v16 = vpop.f32.mrf.mxu2  ;;  %v895_v47 = vpop.f32.mrf.mxu3  ;;  %v1745_v17 = vpack.c.bf16 %v1716_v14, %v1715_v12  ;;  %v1837_v21 = vadd.f32 %v2945_v28, %v1836_v10 }
 0x22a   : > { %1069 = vst.msk [vmem:[#allocation2 + $0x248] sm:$0xff] %vm995_vm1, %v857_v16 }
 0x22b   : > { %1084 = vst.msk [vmem:[#allocation2 + $0x2c0] sm:$0xff] %vm995_vm1, %v895_v47  ;;  %v740_v20 = vpop.f32.mrf.mxu0  ;;  %2383 = vmatmul.msk.bf16.gmra.mxu1 %vm995_vm1, %v1745_v17  ;;  %v1948_v25 = vmul.f32 0.01, %v1837_v21  ;;  %vm1916_vm8 = vcmp.gt.f32.partialorder %v1837_v21, 0.0 }
 0x22c   : > { %1022 = vst.msk [vmem:[#allocation2 + $0xd0] sm:$0xff] %vm995_vm1, %v740_v20 }
 0x22d   : > { %v1980_v33 = vsel %vm1916_vm8, %v1837_v21, %v1948_v25 }
 0x22e   : > { %2327 = vmatmul.msk.bf16.gmra.mxu0 %vm473_vm0, %v2763_v50  ;;  %v463_v41 = vpop.trf.xlu1 }
 0x230   : > { %v1838_v23 = vpop.f32.mrf.mxu1 }
 0x231   : > { %v1839_v27 = vadd.f32 %v2945_v28, %v1838_v23  ;;  %v860_v38 = vpop.f32.mrf.mxu2  ;;  %v897_v51 = vpop.f32.mrf.mxu3 }
 0x232   : > { %1070 = vst.msk [vmem:[#allocation2 + $0x250] sm:$0xff] %vm995_vm1, %v860_v38 }
 0x233   : > { %vm1917_vm9 = vcmp.gt.f32.partialorder %v1839_v27, 0.0  ;;  %v1949_v30 = vmul.f32 0.01, %v1839_v27  ;;  %1085 = vst.msk [vmem:[#allocation2 + $0x2c8] sm:$0xff] %vm995_vm1, %v897_v51  ;;  %v742_v31 = vpop.f32.mrf.mxu0 }
 0x234   : > { %1023 = vst.msk [vmem:[#allocation2 + $0xd8] sm:$0xff] %vm995_vm1, %v742_v31 }
 0x235   : > { %v1981_v50 = vsel %vm1917_vm9, %v1839_v27, %v1949_v30 }
 0x236   : > { %v2012_v34 = vpack.c.bf16 %v1981_v50, %v1980_v33  ;;  %2359 = vmatmul.msk.bf16.gmra.mxu3 %vm473_vm0, %v461_v18  ;;  %v2971_v48 = vpop.trf.xlu1 }
 0x238   : > { %2401 = vmatmul.msk.bf16.vlgmr.msrb.gmra.mxu2 %vm473_vm0, %v2012_v34 }
 0x239   : > { %v862_v35 = vpop.f32.mrf.mxu2  ;;  %v900_v36 = vpop.f32.mrf.mxu3 }
 0x23a   : > { %1071 = vst.msk [vmem:[#allocation2 + $0x258] sm:$0xff] %vm995_vm1, %v862_v35 }
 0x23b   : > { %1086 = vst.msk [vmem:[#allocation2 + $0x2d0] sm:$0xff] %vm995_vm1, %v900_v36  ;;  %v745_v40 = vpop.f32.mrf.mxu0  ;;  %v1137_v53 = vld [vmem:[#allocation2 + $0xc0] ss:$4 sm:$0xff]  ;;  %v1235_v54 = vld [vmem:[#allocation2 + $0xc1] ss:$4 sm:$0xff] }
 0x23c   : > { %1024 = vst.msk [vmem:[#allocation2 + $0xe0] sm:$0xff] %vm995_vm1, %v745_v40  ;;  %v1195_v56 = vmul.f32 %v2798_v11, %v1137_v53  ;;  %v1293_v57 = vmul.f32 %v2800_v13, %v1235_v54  ;;  %v1365_v24 = vld [vmem:[#allocation2 + $0xc2] ss:$4 sm:$0xff]  ;;  %v1495_v0 = vld [vmem:[#allocation2 + $0xc3] ss:$4 sm:$0xff] }
 0x23d   : > { %v1553_v5 = vmul.f32 %v2813_v26, %v1495_v0 }
 0x23e   : > { %2328 = vmatmul.msk.bf16.gmra.mxu0 %vm473_vm0, %v2771_v55  ;;  %v465_v60 = vpop.trf.xlu1  ;;  %v1325_v62 = vadd.f32 %v1293_v57, %v1195_v56 }
 0x241   : > { %v865_v42 = vpop.f32.mrf.mxu2  ;;  %v902_v44 = vpop.f32.mrf.mxu3 }
 0x242   : > { %1072 = vst.msk [vmem:[#allocation2 + $0x260] sm:$0xff] %vm995_vm1, %v865_v42 }
 0x243   : > { %1087 = vst.msk [vmem:[#allocation2 + $0x2d8] sm:$0xff] %vm995_vm1, %v902_v44  ;;  %v747_v45 = vpop.f32.mrf.mxu0 }
 0x244   : > { %1025 = vst.msk [vmem:[#allocation2 + $0xe8] sm:$0xff] %vm995_vm1, %v747_v45 }
 0x246   : > { %2360 = vmatmul.msk.bf16.gmra.mxu3 %vm473_vm0, %v463_v41 }
 0x249   : > { %v867_v49 = vpop.f32.mrf.mxu2  ;;  %v905_v52 = vpop.f32.mrf.mxu3 }
 0x24a   : > { %1073 = vst.msk [vmem:[#allocation2 + $0x268] sm:$0xff] %vm995_vm1, %v867_v49 }
 0x24b   : > { %1088 = vst.msk [vmem:[#allocation2 + $0x2e0] sm:$0xff] %vm995_vm1, %v905_v52  ;;  %v750_v55 = vpop.f32.mrf.mxu0 }
 0x24c   : > { %1026 = vst.msk [vmem:[#allocation2 + $0xf0] sm:$0xff] %vm995_vm1, %v750_v55 }
 0x24e   : > { %2329 = vmatmul.msk.bf16.gmra.mxu0 %vm473_vm0, %v2779_v61  ;;  %v1423_v61 = vmul.f32 %v2808_v19, %v1365_v24 }
 0x250   : > { %v1455_v1 = vadd.f32 %v1423_v61, %v1325_v62 }
 0x251   : > { %v870_v39 = vpop.f32.mrf.mxu2  ;;  %v907_v58 = vpop.f32.mrf.mxu3 }
 0x252   : > { %1074 = vst.msk [vmem:[#allocation2 + $0x270] sm:$0xff] %vm995_vm1, %v870_v39  ;;  %v1585_v10 = vadd.f32 %v1553_v5, %v1455_v1 }
 0x253   : > { %1089 = vst.msk [vmem:[#allocation2 + $0x2e8] sm:$0xff] %vm995_vm1, %v907_v58  ;;  %v752_v59 = vpop.f32.mrf.mxu0 }
 0x254   : > { %1027 = vst.msk [vmem:[#allocation2 + $0xf8] sm:$0xff] %vm995_vm1, %v752_v59  ;;  %v1621_v18 = vadd.f32 %v2823_v37, %v1585_v10 }
 0x256   : > { %2361 = vmatmul.msk.bf16.gmra.mxu3 %vm473_vm0, %v465_v60  ;;  %v1685_v27 = vmul.f32 0.01, %v1621_v18  ;;  %vm1653_vm10 = vcmp.gt.f32.partialorder %v1621_v18, 0.0 }
 0x258   : > { %v1717_v30 = vsel %vm1653_vm10, %v1621_v18, %v1685_v27 }
 0x259   : > { %v872_v2 = vpop.f32.mrf.mxu2  ;;  %v910_v3 = vpop.f32.mrf.mxu3 }
 0x25a   : > { %1075 = vst.msk [vmem:[#allocation2 + $0x278] sm:$0xff] %vm995_vm1, %v872_v2 }
 0x25b   : > { %1090 = vst.msk [vmem:[#allocation2 + $0x2f0] sm:$0xff] %vm995_vm1, %v910_v3  ;;  %v755_v6 = vpop.f32.mrf.mxu0  ;;  %v1139_v7 = vld [vmem:[#allocation2 + $0xe0] ss:$4 sm:$0xff]  ;;  %v1237_v8 = vld [vmem:[#allocation2 + $0xe1] ss:$4 sm:$0xff] }
 0x25c   : > { %1028 = vst.msk [vmem:[#allocation2 + $0x100] sm:$0xff] %vm995_vm1, %v755_v6  ;;  %v1196_v46 = vmul.f32 %v2798_v11, %v1139_v7  ;;  %v1294_v43 = vmul.f32 %v2800_v13, %v1237_v8  ;;  %v1367_v9 = vld [vmem:[#allocation2 + $0xe2] ss:$4 sm:$0xff]  ;;  %v1497_v12 = vld [vmem:[#allocation2 + $0xe3] ss:$4 sm:$0xff] }
 0x25d   : > { %v1424_v16 = vmul.f32 %v2808_v19, %v1367_v9  ;;  %v1554_v17 = vmul.f32 %v2813_v26, %v1497_v12 }
 0x25e   : > { %v1326_v14 = vadd.f32 %v1294_v43, %v1196_v46 }
 0x260   : > { %v1456_v47 = vadd.f32 %v1424_v16, %v1326_v14 }
 0x261   : > { %v912_v20 = vpop.f32.mrf.mxu3 }
 0x262   : > { %1091 = vst.msk [vmem:[#allocation2 + $0x2f8] sm:$0xff] %vm995_vm1, %v912_v20  ;;  %v1586_v21 = vadd.f32 %v1554_v17, %v1456_v47 }
 0x263   : > { %v757_v23 = vpop.f32.mrf.mxu0 }
 0x264   : > { %1029 = vst.msk [vmem:[#allocation2 + $0x108] sm:$0xff] %vm995_vm1, %v757_v23  ;;  %v1622_v25 = vadd.f32 %v2823_v37, %v1586_v21 }
 0x266   : > { %2362 = vmatmul.msk.bf16.gmra.mxu3 %vm473_vm0, %v2860_v22  ;;  %vm1654_vm11 = vcmp.gt.f32.partialorder %v1622_v25, 0.0  ;;  %v1686_v38 = vmul.f32 0.01, %v1622_v25 }
 0x268   : > { %v1841_v51 = vpop.f32.mrf.mxu1  ;;  %v1718_v31 = vsel %vm1654_vm11, %v1622_v25, %v1686_v38 }
 0x269   : > { %v915_v33 = vpop.f32.mrf.mxu3  ;;  %v1746_v50 = vpack.c.bf16 %v1718_v31, %v1717_v30  ;;  %v1842_v35 = vadd.f32 %v2945_v28, %v1841_v51 }
 0x26a   : > { %1092 = vst.msk [vmem:[#allocation2 + $0x300] sm:$0xff] %vm995_vm1, %v915_v33 }
 0x26b   : > { %v760_v34 = vpop.f32.mrf.mxu0  ;;  %2384 = vmatmul.msk.bf16.gmra.mxu1 %vm995_vm1, %v1746_v50  ;;  %v1950_v40 = vmul.f32 0.01, %v1842_v35  ;;  %vm1918_vm12 = vcmp.gt.f32.partialorder %v1842_v35, 0.0 }
 0x26c   : > { %1030 = vst.msk [vmem:[#allocation2 + $0x110] sm:$0xff] %vm995_vm1, %v760_v34 }
 0x26d   : > { %v1982_v45 = vsel %vm1918_vm12, %v1842_v35, %v1950_v40 }
 0x270   : > { %v1843_v36 = vpop.f32.mrf.mxu1 }
 0x271   : > { %v1844_v22 = vadd.f32 %v2945_v28, %v1843_v36  ;;  %v917_v41 = vpop.f32.mrf.mxu3 }
 0x272   : > { %1093 = vst.msk [vmem:[#allocation2 + $0x308] sm:$0xff] %vm995_vm1, %v917_v41 }
 0x273   : > { %vm1919_vm13 = vcmp.gt.f32.partialorder %v1844_v22, 0.0  ;;  %v1951_v42 = vmul.f32 0.01, %v1844_v22  ;;  %v762_v44 = vpop.f32.mrf.mxu0 }
 0x274   : > { %1031 = vst.msk [vmem:[#allocation2 + $0x118] sm:$0xff] %vm995_vm1, %v762_v44 }
 0x275   : > { %v1983_v49 = vsel %vm1919_vm13, %v1844_v22, %v1951_v42 }
 0x276   : > { %2363 = vmatmul.msk.bf16.gmra.mxu3 %vm473_vm0, %v2879_v63  ;;  %v2013_v52 = vpack.c.bf16 %v1983_v49, %v1982_v45  ;;  %v3052_v49 = vld [vmem:[%s3380_s7] ss:$0 sm:$0xff] }
 0x278   : > { %2402 = vmatmul.msk.bf16.gmra.mxu2 %vm473_vm0, %v2013_v52 }
 0x279   : > { %v920_v55 = vpop.f32.mrf.mxu3 }
 0x27a   : > { %1094 = vst.msk [vmem:[#allocation2 + $0x310] sm:$0xff] %vm995_vm1, %v920_v55 }
 0x27b   : > { %v765_v53 = vpop.f32.mrf.mxu0  ;;  %v1141_v39 = vld [vmem:[#allocation2 + $0x100] ss:$4 sm:$0xff]  ;;  %v1239_v58 = vld [vmem:[#allocation2 + $0x101] ss:$4 sm:$0xff]  ;;  %v1369_v61 = vld [vmem:[#allocation2 + $0x102] ss:$4 sm:$0xff] }
 0x27c   : > { %1032 = vst.msk [vmem:[#allocation2 + $0x120] sm:$0xff] %vm995_vm1, %v765_v53  ;;  %v1197_v59 = vmul.f32 %v2798_v11, %v1141_v39  ;;  %v1295_v60 = vmul.f32 %v2800_v13, %v1239_v58  ;;  %v1425_v0 = vmul.f32 %v2808_v19, %v1369_v61  ;;  %v1499_v1 = vld [vmem:[#allocation2 + $0x103] ss:$4 sm:$0xff] }
 0x27d   : > { %v1555_v5 = vmul.f32 %v2813_v26, %v1499_v1 }
 0x281   : > { %v922_v54 = vpop.f32.mrf.mxu3 }
 0x282   : > { %1095 = vst.msk [vmem:[#allocation2 + $0x318] sm:$0xff] %vm995_vm1, %v922_v54 }
 0x283   : > { %v767_v56 = vpop.f32.mrf.mxu0 }
 0x284   : > { %1033 = vst.msk [vmem:[#allocation2 + $0x128] sm:$0xff] %vm995_vm1, %v767_v56 }
 0x286   : > { %2364 = vmatmul.msk.bf16.gmra.mxu3 %vm473_vm0, %v2895_v15  ;;  %v1327_v15 = vadd.f32 %v1295_v60, %v1197_v59 }
 0x288   : > { %v1457_v2 = vadd.f32 %v1425_v0, %v1327_v15  ;;  %v466_v0 = vpop.trf.xlu1 }
 0x289   : > { %v925_v57 = vpop.f32.mrf.mxu3 }
 0x28a   : > { %1096 = vst.msk [vmem:[#allocation2 + $0x320] sm:$0xff] %vm995_vm1, %v925_v57 }
 0x28b   : > { %v770_v63 = vpop.f32.mrf.mxu0 }
 0x28c   : > { %1034 = vst.msk [vmem:[#allocation2 + $0x130] sm:$0xff] %vm995_vm1, %v770_v63 }
 0x291   : > { %v927_v24 = vpop.f32.mrf.mxu3 }
 0x292   : > { %1097 = vst.msk [vmem:[#allocation2 + $0x328] sm:$0xff] %vm995_vm1, %v927_v24 }
 0x293   : > { %v772_v62 = vpop.f32.mrf.mxu0 }
 0x294   : > { %1035 = vst.msk [vmem:[#allocation2 + $0x138] sm:$0xff] %vm995_vm1, %v772_v62 }
 0x296   : > { %2365 = vmatmul.msk.bf16.gmra.mxu3 %vm473_vm0, %v2910_v29  ;;  %v1587_v29 = vadd.f32 %v1555_v5, %v1457_v2 }
 0x298   : > { %v1623_v17 = vadd.f32 %v2823_v37, %v1587_v29 }
 0x299   : > { %v930_v3 = vpop.f32.mrf.mxu3 }
 0x29a   : > { %1098 = vst.msk [vmem:[#allocation2 + $0x330] sm:$0xff] %vm995_vm1, %v930_v3  ;;  %v1687_v25 = vmul.f32 0.01, %v1623_v17  ;;  %vm1655_vm14 = vcmp.gt.f32.partialorder %v1623_v17, 0.0 }
 0x29b   : > { %v775_v6 = vpop.f32.mrf.mxu0  ;;  %v1143_v7 = vld [vmem:[#allocation2 + $0x120] ss:$4 sm:$0xff]  ;;  %v1241_v8 = vld [vmem:[#allocation2 + $0x121] ss:$4 sm:$0xff]  ;;  %v1371_v46 = vld [vmem:[#allocation2 + $0x122] ss:$4 sm:$0xff] }
 0x29c   : > { %1036 = vst.msk [vmem:[#allocation2 + $0x140] sm:$0xff] %vm995_vm1, %v775_v6  ;;  %v1198_v43 = vmul.f32 %v2798_v11, %v1143_v7  ;;  %v1296_v9 = vmul.f32 %v2800_v13, %v1241_v8  ;;  %v1501_v10 = vld [vmem:[#allocation2 + $0x123] ss:$4 sm:$0xff]  ;;  %v1426_v14 = vmul.f32 %v2808_v19, %v1371_v46  ;;  %v1719_v51 = vsel %vm1655_vm14, %v1623_v17, %v1687_v25  ;;  %v1149_v6 = vld [vmem:[#allocation2 + $0x180] ss:$4 sm:$0xff] }
 0x29d   : > { %v1556_v47 = vmul.f32 %v2813_v26, %v1501_v10  ;;  %v1151_v7 = vld [vmem:[#allocation2 + $0x1a0] ss:$4 sm:$0xff]  ;;  %v1247_v8 = vld [vmem:[#allocation2 + $0x181] ss:$4 sm:$0xff]  ;;  %v1379_v25 = vld [vmem:[#allocation2 + $0x1a2] ss:$4 sm:$0xff] }
 0x29e   : > { %v1328_v12 = vadd.f32 %v1296_v9, %v1198_v43  ;;  %v1249_v43 = vld [vmem:[#allocation2 + $0x1a1] ss:$4 sm:$0xff] }
 0x2a0   : > { %v1458_v16 = vadd.f32 %v1426_v14, %v1328_v12  ;;  %v1201_v14 = vmul.f32 %v2798_v11, %v1149_v6  ;;  %v1381_v6 = vld [vmem:[#allocation2 + $0x1c2] ss:$4 sm:$0xff] }
 0x2a1   : > { %v932_v18 = vpop.f32.mrf.mxu3 }
 0x2a2   : > { %1099 = vst.msk [vmem:[#allocation2 + $0x338] sm:$0xff] %vm995_vm1, %v932_v18  ;;  %v1588_v20 = vadd.f32 %v1556_v47, %v1458_v16  ;;  %v1202_v16 = vmul.f32 %v2798_v11, %v1151_v7  ;;  %v1299_v47 = vmul.f32 %v2800_v13, %v1247_v8  ;;  %v1383_v7 = vld [vmem:[#allocation2 + $0x1e2] ss:$4 sm:$0xff] }
 0x2a3   : > { %v777_v21 = vpop.f32.mrf.mxu0 }
 0x2a4   : > { %1037 = vst.msk [vmem:[#allocation2 + $0x148] sm:$0xff] %vm995_vm1, %v777_v21  ;;  %v1624_v23 = vadd.f32 %v2823_v37, %v1588_v20  ;;  %v1300_v21 = vmul.f32 %v2800_v13, %v1249_v43 }
 0x2a6   : > { %2366 = vmatmul.msk.bf16.gmra.mxu3 %vm473_vm0, %v2935_v4  ;;  %vm1656_vm15 = vcmp.gt.f32.partialorder %v1624_v23, 0.0  ;;  %v1688_v27 = vmul.f32 0.01, %v1624_v23 }
 0x2a8   : > { %v1846_v38 = vpop.f32.mrf.mxu1  ;;  %v1720_v30 = vsel %vm1656_vm15, %v1624_v23, %v1688_v27  ;;  %v1377_v23 = vld [vmem:[#allocation2 + $0x182] ss:$4 sm:$0xff] }
 0x2a9   : > { %v935_v31 = vpop.f32.mrf.mxu3  ;;  %v1747_v33 = vpack.c.bf16 %v1720_v30, %v1719_v51  ;;  %v1847_v34 = vadd.f32 %v2945_v28, %v1846_v38  ;;  %v1331_v30 = vadd.f32 %v1299_v47, %v1201_v14  ;;  %v1431_v14 = vmul.f32 %v2808_v19, %v1381_v6 }
 0x2aa   : > { %1100 = vst.msk [vmem:[#allocation2 + $0x340] sm:$0xff] %vm995_vm1, %v935_v31  ;;  %v1429_v31 = vmul.f32 %v2808_v19, %v1377_v23  ;;  %v1432_v47 = vmul.f32 %v2808_v19, %v1383_v7 }
 0x2ab   : > { %v780_v50 = vpop.f32.mrf.mxu0  ;;  %2385 = vmatmul.msk.bf16.gmra.mxu1 %vm995_vm1, %v1747_v33  ;;  %v1952_v4 = vmul.f32 0.01, %v1847_v34  ;;  %vm1920_vm2 = vcmp.gt.f32.partialorder %v1847_v34, 0.0  ;;  %v1430_v33 = vmul.f32 %v2808_v19, %v1379_v25 }
 0x2ac   : > { %1038 = vst.msk [vmem:[#allocation2 + $0x150] sm:$0xff] %vm995_vm1, %v780_v50 }
 0x2ad   : > { %v1984_v42 = vsel %vm1920_vm2, %v1847_v34, %v1952_v4  ;;  %v1332_v4 = vadd.f32 %v1300_v21, %v1202_v16 }
 0x2b0   : > { %v1848_v35 = vpop.f32.mrf.mxu1 }
 0x2b1   : > { %v1849_v36 = vadd.f32 %v2945_v28, %v1848_v35  ;;  %v937_v40 = vpop.f32.mrf.mxu3 }
 0x2b2   : > { %1101 = vst.msk [vmem:[#allocation2 + $0x348] sm:$0xff] %vm995_vm1, %v937_v40 }
 0x2b3   : > { %vm1921_vm3 = vcmp.gt.f32.partialorder %v1849_v36, 0.0  ;;  %v1953_v22 = vmul.f32 0.01, %v1849_v36  ;;  %v782_v41 = vpop.f32.mrf.mxu0 }
 0x2b4   : > { %1039 = vst.msk [vmem:[#allocation2 + $0x158] sm:$0xff] %vm995_vm1, %v782_v41 }
 0x2b5   : > { %v1985_v44 = vsel %vm1921_vm3, %v1849_v36, %v1953_v22  ;;  %v1507_v36 = vld [vmem:[#allocation2 + $0x183] ss:$4 sm:$0xff] }
 0x2b6   : > { %2367 = vmatmul.msk.bf16.gmra.mxu3 %vm473_vm0, %v2958_v32  ;;  %v2014_v45 = vpack.c.bf16 %v1985_v44, %v1984_v42  ;;  %v1509_v22 = vld [vmem:[#allocation2 + $0x1a3] ss:$4 sm:$0xff]  ;;  %v1461_v42 = vadd.f32 %v1429_v31, %v1331_v30  ;;  %v1559_v44 = vmul.f32 %v2813_v26, %v1507_v36 }
 0x2b8   : > { %2403 = vmatmul.msk.bf16.gmra.mxu2 %vm473_vm0, %v2014_v45 }
 0x2b9   : > { %v940_v52 = vpop.f32.mrf.mxu3 }
 0x2ba   : > { %1102 = vst.msk [vmem:[#allocation2 + $0x350] sm:$0xff] %vm995_vm1, %v940_v52 }
 0x2bb   : > { %v785_v55 = vpop.f32.mrf.mxu0  ;;  %v2097_v32 = vpop.f32.mrf.mxu2  ;;  %v1145_v59 = vld [vmem:[#allocation2 + $0x140] ss:$4 sm:$0xff]  ;;  %v1243_v60 = vld [vmem:[#allocation2 + $0x141] ss:$4 sm:$0xff]  ;;  %v1373_v1 = vld [vmem:[#allocation2 + $0x142] ss:$4 sm:$0xff] }
 0x2bc   : > { %1040 = vst.msk [vmem:[#allocation2 + $0x160] sm:$0xff] %vm995_vm1, %v785_v55  ;;  %v2098_v53 = vadd.f32 %v3052_v49, %v2097_v32  ;;  %v1199_v24 = vmul.f32 %v2798_v11, %v1145_v59  ;;  %v1297_v62 = vmul.f32 %v2800_v13, %v1243_v60  ;;  %v1427_v2 = vmul.f32 %v2808_v19, %v1373_v1  ;;  %v1503_v3 = vld [vmem:[#allocation2 + $0x143] ss:$4 sm:$0xff]  ;;  %v1153_v60 = vld [vmem:[#allocation2 + $0x1c0] ss:$4 sm:$0xff] }
 0x2bd   : > { %v1557_v9 = vmul.f32 %v2813_v26, %v1503_v3  ;;  %v1462_v55 = vadd.f32 %v1430_v33, %v1332_v4  ;;  %v1560_v32 = vmul.f32 %v2813_v26, %v1509_v22  ;;  %v1257_v22 = vld [vmem:[#allocation2 + $0x221] ss:$4 sm:$0xff] }
 0x2be   : > { %2178 = vst.msk [vmem:[%s3058_s14] sm:$0xff] %vm2177_vm4, %v2098_v53 }
 0x2c1   : > { %v942_v54 = vpop.f32.mrf.mxu3 }
 0x2c2   : > { %1103 = vst.msk [vmem:[#allocation2 + $0x358] sm:$0xff] %vm995_vm1, %v942_v54 }
 0x2c3   : > { %v787_v56 = vpop.f32.mrf.mxu0  ;;  %v2099_v57 = vpop.f32.mrf.mxu2 }
 0x2c4   : > { %1041 = vst.msk [vmem:[#allocation2 + $0x168] sm:$0xff] %vm995_vm1, %v787_v56  ;;  %v2100_v63 = vadd.f32 %v3052_v49, %v2099_v57 }
 0x2c6   : > { %2179 = vst.msk [vmem:[%s3058_s14 + $0x8] sm:$0xff] %vm2177_vm4, %v2100_v63  ;;  %2368 = vmatmul.msk.bf16.gmra.mxu3 %vm473_vm0, %v2971_v48  ;;  %v1329_v48 = vadd.f32 %v1297_v62, %v1199_v24  ;;  %v1591_v63 = vadd.f32 %v1559_v44, %v1461_v42  ;;  %v1251_v24 = vld [vmem:[#allocation2 + $0x1c1] ss:$4 sm:$0xff]  ;;  %v1157_v42 = vld [vmem:[#allocation2 + $0x200] ss:$4 sm:$0xff] }
 0x2c7   : > { %v1253_v62 = vld [vmem:[#allocation2 + $0x1e1] ss:$4 sm:$0xff] }
 0x2c8   : > { %v1459_v5 = vadd.f32 %v1427_v2, %v1329_v48  ;;  %v1203_v48 = vmul.f32 %v2798_v11, %v1153_v60  ;;  %v1301_v2 = vmul.f32 %v2800_v13, %v1251_v24  ;;  %v1255_v44 = vld [vmem:[#allocation2 + $0x201] ss:$4 sm:$0xff]  ;;  %v1385_v60 = vld [vmem:[#allocation2 + $0x202] ss:$4 sm:$0xff] }
 0x2c9   : > { %v945_v39 = vpop.f32.mrf.mxu3 }
 0x2ca   : > { %1104 = vst.msk [vmem:[#allocation2 + $0x360] sm:$0xff] %vm995_vm1, %v945_v39  ;;  %v1589_v20 = vadd.f32 %v1557_v9, %v1459_v5  ;;  %v1592_v39 = vadd.f32 %v1560_v32, %v1462_v55  ;;  %v1302_v5 = vmul.f32 %v2800_v13, %v1253_v62  ;;  %v1304_v32 = vmul.f32 %v2800_v13, %v1257_v22 }
 0x2cb   : > { %v790_v58 = vpop.f32.mrf.mxu0 }
 0x2cc   : > { %1042 = vst.msk [vmem:[#allocation2 + $0x170] sm:$0xff] %vm995_vm1, %v790_v58  ;;  %v1625_v35 = vadd.f32 %v2823_v37, %v1589_v20  ;;  %v1513_v20 = vld [vmem:[#allocation2 + $0x1e3] ss:$4 sm:$0xff] }
 0x2cd   : > { %v1562_v33 = vmul.f32 %v2813_v26, %v1513_v20 }
 0x2ce   : > { %v1689_v52 = vmul.f32 0.01, %v1625_v35  ;;  %vm1657_vm5 = vcmp.gt.f32.partialorder %v1625_v35, 0.0 }
 0x2d0   : > { %v1721_v56 = vsel %vm1657_vm5, %v1625_v35, %v1689_v52 }
 0x2d1   : > { %v947_v61 = vpop.f32.mrf.mxu3 }
 0x2d2   : > { %1105 = vst.msk [vmem:[#allocation2 + $0x368] sm:$0xff] %vm995_vm1, %v947_v61  ;;  %v3101_v61 = vld [vmem:[%s3376_s3] ss:$0 sm:$0xff] }
 0x2d3   : > { %v792_v15 = vpop.f32.mrf.mxu0 }
 0x2d4   : > { %1043 = vst.msk [vmem:[#allocation2 + $0x178] sm:$0xff] %vm995_vm1, %v792_v15  ;;  %v1627_v15 = vadd.f32 %v3101_v61, %v1591_v63 }
 0x2d6   : > { %2369 = vmatmul.msk.bf16.gmra.mxu3 %vm473_vm0, %v466_v0  ;;  %v1628_v0 = vadd.f32 %v3101_v61, %v1592_v39  ;;  %vm1659_vm7 = vcmp.gt.f32.partialorder %v1627_v15, 0.0 }
 0x2d8   : > { %v1692_v43 = vmul.f32 0.01, %v1628_v0  ;;  %vm1660_vm9 = vcmp.gt.f32.partialorder %v1628_v0, 0.0 }
 0x2d9   : > { %v950_v46 = vpop.f32.mrf.mxu3 }
 0x2da   : > { %1106 = vst.msk [vmem:[#allocation2 + $0x370] sm:$0xff] %vm995_vm1, %v950_v46  ;;  %v1691_v46 = vmul.f32 0.01, %v1627_v15 }
 0x2db   : > { %v1147_v29 = vld [vmem:[#allocation2 + $0x160] ss:$4 sm:$0xff]  ;;  %v1245_v10 = vld [vmem:[#allocation2 + $0x161] ss:$4 sm:$0xff]  ;;  %v1375_v12 = vld [vmem:[#allocation2 + $0x162] ss:$4 sm:$0xff] }
 0x2dc   : > { %v1200_v17 = vmul.f32 %v2798_v11, %v1147_v29  ;;  %v1298_v18 = vmul.f32 %v2800_v13, %v1245_v10  ;;  %v1505_v27 = vld [vmem:[#allocation2 + $0x163] ss:$4 sm:$0xff]  ;;  %v1428_v51 = vmul.f32 %v2808_v19, %v1375_v12  ;;  %v1333_v12 = vadd.f32 %v1301_v2, %v1203_v48 }
 0x2dd   : > { %v1558_v34 = vmul.f32 %v2813_v26, %v1505_v27  ;;  %v1723_v21 = vsel %vm1659_vm7, %v1627_v15, %v1691_v46  ;;  %v1724_v27 = vsel %vm1660_vm9, %v1628_v0, %v1692_v43  ;;  %v1517_v15 = vld [vmem:[#allocation2 + $0x223] ss:$4 sm:$0xff]  ;;  %v1433_v48 = vmul.f32 %v2808_v19, %v1385_v60 }
 0x2de   : > { %v1330_v38 = vadd.f32 %v1298_v18, %v1200_v17  ;;  %v1511_v17 = vld [vmem:[#allocation2 + $0x1c3] ss:$4 sm:$0xff]  ;;  %v1564_v6 = vmul.f32 %v2813_v26, %v1517_v15 }
 0x2df   : > { %v1561_v31 = vmul.f32 %v2813_v26, %v1511_v17 }
 0x2e0   : > { %v1460_v50 = vadd.f32 %v1428_v51, %v1330_v38  ;;  %v1463_v38 = vadd.f32 %v1431_v14, %v1333_v12  ;;  %v1161_v12 = vld [vmem:[#allocation2 + $0x240] ss:$4 sm:$0xff]  ;;  %v1259_v14 = vld [vmem:[#allocation2 + $0x241] ss:$4 sm:$0xff] }
 0x2e1   : > { %v952_v40 = vpop.f32.mrf.mxu3  ;;  %v1207_v20 = vmul.f32 %v2798_v11, %v1161_v12 }
 0x2e2   : > { %1107 = vst.msk [vmem:[#allocation2 + $0x378] sm:$0xff] %vm995_vm1, %v952_v40  ;;  %v1590_v41 = vadd.f32 %v1558_v34, %v1460_v50  ;;  %v1749_v34 = vpack.c.bf16 %v1724_v27, %v1723_v21  ;;  %v1593_v35 = vadd.f32 %v1561_v31, %v1463_v38  ;;  %v1159_v40 = vld [vmem:[#allocation2 + $0x220] ss:$4 sm:$0xff]  ;;  %v1305_v21 = vmul.f32 %v2800_v13, %v1259_v14 }
 0x2e3   : > { %v1206_v55 = vmul.f32 %v2798_v11, %v1159_v40 }
 0x2e4   : > { %v1626_v45 = vadd.f32 %v2823_v37, %v1590_v41  ;;  %v1155_v37 = vld [vmem:[#allocation2 + $0x1e0] ss:$4 sm:$0xff]  ;;  %v1337_v31 = vadd.f32 %v1305_v21, %v1207_v20 }
 0x2e5   : > { %v1204_v3 = vmul.f32 %v2798_v11, %v1155_v37  ;;  %v1169_v21 = vld [vmem:[#allocation2 + $0x2c0] ss:$4 sm:$0xff] }
 0x2e6   : > { %vm1658_vm6 = vcmp.gt.f32.partialorder %v1626_v45, 0.0  ;;  %v1690_v53 = vmul.f32 0.01, %v1626_v45 }
 0x2e7   : > { %v1334_v16 = vadd.f32 %v1302_v5, %v1204_v3  ;;  %v1515_v3 = vld [vmem:[#allocation2 + $0x203] ss:$4 sm:$0xff] }
 0x2e8   : > { %v1851_v54 = vpop.f32.mrf.mxu1  ;;  %v1722_v57 = vsel %vm1658_vm6, %v1626_v45, %v1690_v53  ;;  %v1629_v45 = vadd.f32 %v3101_v61, %v1593_v35  ;;  %v1205_v53 = vmul.f32 %v2798_v11, %v1157_v42  ;;  %v1563_v46 = vmul.f32 %v2813_v26, %v1515_v3  ;;  %v1525_v3 = vld [vmem:[#allocation2 + $0x2a3] ss:$4 sm:$0xff] }
 0x2e9   : > { %v955_v58 = vpop.f32.mrf.mxu3  ;;  %v1748_v59 = vpack.c.bf16 %v1722_v57, %v1721_v56  ;;  %v1852_v1 = vadd.f32 %v2945_v28, %v1851_v54  ;;  %v1464_v30 = vadd.f32 %v1432_v47, %v1334_v16  ;;  %v1303_v54 = vmul.f32 %v2800_v13, %v1255_v44  ;;  %v1387_v57 = vld [vmem:[#allocation2 + $0x222] ss:$4 sm:$0xff] }
 0x2ea   : > { %1108 = vst.msk [vmem:[#allocation2 + $0x380] sm:$0xff] %vm995_vm1, %v955_v58  ;;  %v1693_v63 = vmul.f32 0.01, %v1629_v45  ;;  %v1336_v58 = vadd.f32 %v1304_v32, %v1206_v55  ;;  %vm1661_vm11 = vcmp.gt.f32.partialorder %v1629_v45, 0.0  ;;  %v1434_v62 = vmul.f32 %v2808_v19, %v1387_v57  ;;  %v1167_v55 = vld [vmem:[#allocation2 + $0x2a0] ss:$4 sm:$0xff] }
 0x2eb   : > { %2386 = vmatmul.msk.bf16.gmra.mxu1 %vm995_vm1, %v1748_v59  ;;  %v1954_v9 = vmul.f32 0.01, %v1852_v1  ;;  %vm1922_vm8 = vcmp.gt.f32.partialorder %v1852_v1, 0.0  ;;  %v1594_v4 = vadd.f32 %v1562_v33, %v1464_v30  ;;  %v1335_v37 = vadd.f32 %v1303_v54, %v1205_v53  ;;  %v1265_v32 = vld [vmem:[#allocation2 + $0x2a1] ss:$4 sm:$0xff] }
 0x2ec   : > { %v1725_v0 = vsel %vm1661_vm11, %v1629_v45, %v1693_v63  ;;  %v1466_v2 = vadd.f32 %v1434_v62, %v1336_v58  ;;  %v1165_v54 = vld [vmem:[#allocation2 + $0x280] ss:$4 sm:$0xff]  ;;  %v1210_v63 = vmul.f32 %v2798_v11, %v1167_v55 }
 0x2ed   : > { %v1986_v23 = vsel %vm1922_vm8, %v1852_v1, %v1954_v9  ;;  %v1630_v52 = vadd.f32 %v3101_v61, %v1594_v4  ;;  %v1465_v5 = vadd.f32 %v1433_v48, %v1335_v37  ;;  %v1163_v9 = vld [vmem:[#allocation2 + $0x260] ss:$4 sm:$0xff]  ;;  %v1395_v37 = vld [vmem:[#allocation2 + $0x2a2] ss:$4 sm:$0xff] }
 0x2ee   : > { %v1596_v43 = vadd.f32 %v1564_v6, %v1466_v2  ;;  %v1208_v47 = vmul.f32 %v2798_v11, %v1163_v9  ;;  %v1438_v2 = vmul.f32 %v2808_v19, %v1395_v37 }
 0x2ef   : > { %v1694_v39 = vmul.f32 0.01, %v1630_v52  ;;  %vm1662_vm12 = vcmp.gt.f32.partialorder %v1630_v52, 0.0 }
 0x2f0   : > { %v1853_v8 = vpop.f32.mrf.mxu1  ;;  %v1632_v16 = vadd.f32 %v3101_v61, %v1596_v43 }
 0x2f1   : > { %v1854_v29 = vadd.f32 %v2945_v28, %v1853_v8  ;;  %v957_v10 = vpop.f32.mrf.mxu3  ;;  %v1726_v1 = vsel %vm1662_vm12, %v1630_v52, %v1694_v39  ;;  %v1308_v39 = vmul.f32 %v2800_v13, %v1265_v32  ;;  %v1529_v32 = vld [vmem:[#allocation2 + $0x2e3] ss:$4 sm:$0xff] }
 0x2f2   : > { %1109 = vst.msk [vmem:[#allocation2 + $0x388] sm:$0xff] %vm995_vm1, %v957_v10  ;;  %v1750_v8 = vpack.c.bf16 %v1726_v1, %v1725_v0  ;;  %v1595_v10 = vadd.f32 %v1563_v46, %v1465_v5  ;;  %v1696_v27 = vmul.f32 0.01, %v1632_v16  ;;  %vm1664_vm13 = vcmp.gt.f32.partialorder %v1632_v16, 0.0  ;;  %v1393_v0 = vld [vmem:[#allocation2 + $0x282] ss:$4 sm:$0xff] }
 0x2f3   : > { %vm1923_vm10 = vcmp.gt.f32.partialorder %v1854_v29, 0.0  ;;  %v1955_v18 = vmul.f32 0.01, %v1854_v29  ;;  %v1340_v15 = vadd.f32 %v1308_v39, %v1210_v63  ;;  %v1437_v6 = vmul.f32 %v2808_v19, %v1393_v0  ;;  %v1273_v0 = vld [vmem:[#allocation2 + $0x321] ss:$4 sm:$0xff] }
 0x2f5   : > { %v1987_v25 = vsel %vm1923_vm10, %v1854_v29, %v1955_v18  ;;  %v1261_v29 = vld [vmem:[#allocation2 + $0x261] ss:$4 sm:$0xff]  ;;  %v1631_v18 = vadd.f32 %v3101_v61, %v1595_v10 }
 0x2f6   : > { %v2015_v51 = vpack.c.bf16 %v1987_v25, %v1986_v23  ;;  %v1306_v17 = vmul.f32 %v2800_v13, %v1261_v29  ;;  %v1391_v25 = vld [vmem:[#allocation2 + $0x262] ss:$4 sm:$0xff]  ;;  %v1568_v29 = vmul.f32 %v2813_v26, %v1525_v3  ;;  %v1271_v3 = vld [vmem:[#allocation2 + $0x301] ss:$4 sm:$0xff] }
 0x2f7   : > { %v1695_v30 = vmul.f32 0.01, %v1631_v18  ;;  %v1436_v33 = vmul.f32 %v2808_v19, %v1391_v25  ;;  %vm1663_vm14 = vcmp.gt.f32.partialorder %v1631_v18, 0.0 }
 0x2f8   : > { %2404 = vmatmul.msk.bf16.gmra.mxu2 %vm473_vm0, %v2015_v51  ;;  %v1338_v38 = vadd.f32 %v1306_v17, %v1208_v47  ;;  %v1389_v51 = vld [vmem:[#allocation2 + $0x242] ss:$4 sm:$0xff]  ;;  %v1171_v47 = vld [vmem:[#allocation2 + $0x2e0] ss:$4 sm:$0xff]  ;;  %v1269_v17 = vld [vmem:[#allocation2 + $0x2e1] ss:$4 sm:$0xff] }
 0x2f9   : > { %v960_v50 = vpop.f32.mrf.mxu3  ;;  %v1435_v35 = vmul.f32 %v2808_v19, %v1389_v51  ;;  %v1727_v40 = vsel %vm1663_vm14, %v1631_v18, %v1695_v30 }
 0x2fa   : > { %1110 = vst.msk [vmem:[#allocation2 + $0x390] sm:$0xff] %vm995_vm1, %v960_v50  ;;  %v1521_v50 = vld [vmem:[#allocation2 + $0x263] ss:$4 sm:$0xff]  ;;  %v1468_v4 = vadd.f32 %v1436_v33, %v1338_v38  ;;  %v1310_v38 = vmul.f32 %v2800_v13, %v1269_v17 }
 0x2fb   : > { %2387 = vmatmul.msk.bf16.gmra.mxu1 %vm995_vm1, %v1749_v34  ;;  %v2102_v36 = vpop.f32.mrf.mxu2  ;;  %v1728_v34 = vsel %vm1664_vm13, %v1632_v16, %v1696_v27  ;;  %v1467_v22 = vadd.f32 %v1435_v35, %v1337_v31  ;;  %v1212_v27 = vmul.f32 %v2798_v11, %v1171_v47  ;;  %v1211_v31 = vmul.f32 %v2798_v11, %v1169_v21  ;;  %v1533_v21 = vld [vmem:[#allocation2 + $0x323] ss:$4 sm:$0xff] }
 0x2fc   : > { %v2103_v41 = vadd.f32 %v3052_v49, %v2102_v36  ;;  %v1519_v36 = vld [vmem:[#allocation2 + $0x243] ss:$4 sm:$0xff]  ;;  %v1751_v44 = vpack.c.bf16 %v1728_v34, %v1727_v40 }
 0x2fd   : > { %v1565_v45 = vmul.f32 %v2813_v26, %v1519_v36  ;;  %v1342_v40 = vadd.f32 %v1310_v38, %v1212_v27  ;;  %v1531_v38 = vld [vmem:[#allocation2 + $0x303] ss:$4 sm:$0xff] }
 0x2fe   : > { %2180 = vst.msk [vmem:[%s3058_s14 + $0x10] sm:$0xff] %vm2177_vm4, %v2103_v41  ;;  %v1566_v41 = vmul.f32 %v2813_v26, %v1521_v50 }
 0x2ff   : > { %v1597_v53 = vadd.f32 %v1565_v45, %v1467_v22 }
 0x300   : > { %v1598_v52 = vadd.f32 %v1566_v41, %v1468_v4  ;;  %v1399_v4 = vld [vmem:[#allocation2 + $0x2e2] ss:$4 sm:$0xff] }
 0x301   : > { %v962_v56 = vpop.f32.mrf.mxu3  ;;  %v1633_v58 = vadd.f32 %v3101_v61, %v1597_v53  ;;  %v1397_v41 = vld [vmem:[#allocation2 + $0x2c2] ss:$4 sm:$0xff]  ;;  %v1440_v45 = vmul.f32 %v2808_v19, %v1399_v4  ;;  %v1179_v4 = vld [vmem:[#allocation2 + $0x360] ss:$4 sm:$0xff] }
 0x302   : > { %1111 = vst.msk [vmem:[#allocation2 + $0x398] sm:$0xff] %vm995_vm1, %v962_v56  ;;  %v1263_v56 = vld [vmem:[#allocation2 + $0x281] ss:$4 sm:$0xff]  ;;  %v1634_v57 = vadd.f32 %v3101_v61, %v1598_v52 }
 0x303   : > { %v2104_v59 = vpop.f32.mrf.mxu2  ;;  %v1307_v60 = vmul.f32 %v2800_v13, %v1263_v56  ;;  %v1697_v1 = vmul.f32 0.01, %v1633_v58  ;;  %vm1665_vm2 = vcmp.gt.f32.partialorder %v1633_v58, 0.0  ;;  %v1472_v56 = vadd.f32 %v1440_v45, %v1342_v40 }
 0x304   : > { %v2105_v24 = vadd.f32 %v3052_v49, %v2104_v59  ;;  %v1209_v59 = vmul.f32 %v2798_v11, %v1165_v54  ;;  %v1698_v62 = vmul.f32 0.01, %v1634_v57  ;;  %vm1666_vm15 = vcmp.gt.f32.partialorder %v1634_v57, 0.0 }
 0x305   : > { %v1729_v43 = vsel %vm1665_vm2, %v1633_v58, %v1697_v1  ;;  %v1439_v54 = vmul.f32 %v2808_v19, %v1397_v41  ;;  %v1570_v58 = vmul.f32 %v2813_v26, %v1529_v32  ;;  %v1275_v41 = vld [vmem:[#allocation2 + $0x341] ss:$4 sm:$0xff] }
 0x306   : > { %2181 = vst.msk [vmem:[%s3058_s14 + $0x18] sm:$0xff] %vm2177_vm4, %v2105_v24  ;;  %v1339_v48 = vadd.f32 %v1307_v60, %v1209_v59  ;;  %v1730_v5 = vsel %vm1666_vm15, %v1634_v57, %v1698_v62  ;;  %v1527_v57 = vld [vmem:[#allocation2 + $0x2c3] ss:$4 sm:$0xff]  ;;  %v1313_v32 = vmul.f32 %v2800_v13, %v1275_v41 }
 0x307   : > { %v1752_v12 = vpack.c.bf16 %v1730_v5, %v1729_v43  ;;  %v1602_v37 = vadd.f32 %v1570_v58, %v1472_v56  ;;  %v1311_v43 = vmul.f32 %v2800_v13, %v1271_v3 }
 0x308   : > { %v1469_v9 = vadd.f32 %v1437_v6, %v1339_v48 }
 0x309   : > { %v965_v7 = vpop.f32.mrf.mxu3  ;;  %v1638_v5 = vadd.f32 %v3101_v61, %v1602_v37 }
 0x30a   : > { %1112 = vst.msk [vmem:[#allocation2 + $0x3a0] sm:$0xff] %vm995_vm1, %v965_v7  ;;  %v1470_v7 = vadd.f32 %v1438_v2, %v1340_v15  ;;  %v1175_v15 = vld [vmem:[#allocation2 + $0x320] ss:$4 sm:$0xff] }
 0x30b   : > { %2388 = vmatmul.msk.bf16.gmra.mxu1 %vm995_vm1, %v1750_v8  ;;  %v1523_v8 = vld [vmem:[#allocation2 + $0x283] ss:$4 sm:$0xff]  ;;  %v1173_v2 = vld [vmem:[#allocation2 + $0x300] ss:$4 sm:$0xff]  ;;  %v1214_v6 = vmul.f32 %v2798_v11, %v1175_v15  ;;  %vm1670_vm8 = vcmp.gt.f32.partialorder %v1638_v5, 0.0 }
 0x30c   : > { %v1567_v14 = vmul.f32 %v2813_v26, %v1523_v8  ;;  %v1600_v16 = vadd.f32 %v1568_v29, %v1470_v7  ;;  %v1312_v7 = vmul.f32 %v2800_v13, %v1273_v0  ;;  %v1403_v29 = vld [vmem:[#allocation2 + $0x322] ss:$4 sm:$0xff] }
 0x30e   : > { %v1599_v18 = vadd.f32 %v1567_v14, %v1469_v9  ;;  %v1636_v25 = vadd.f32 %v3101_v61, %v1600_v16  ;;  %v1401_v16 = vld [vmem:[#allocation2 + $0x302] ss:$4 sm:$0xff] }
 0x310   : > { %v1635_v30 = vadd.f32 %v3101_v61, %v1599_v18  ;;  %v1700_v36 = vmul.f32 0.01, %v1636_v25  ;;  %vm1668_vm6 = vcmp.gt.f32.partialorder %v1636_v25, 0.0 }
 0x311   : > { %v967_v23 = vpop.f32.mrf.mxu3 }
 0x312   : > { %1113 = vst.msk [vmem:[#allocation2 + $0x3a8] sm:$0xff] %vm995_vm1, %v967_v23  ;;  %v1267_v23 = vld [vmem:[#allocation2 + $0x2c1] ss:$4 sm:$0xff]  ;;  %vm1667_vm7 = vcmp.gt.f32.partialorder %v1635_v30, 0.0  ;;  %v1732_v53 = vsel %vm1668_vm6, %v1636_v25, %v1700_v36  ;;  %v1441_v25 = vmul.f32 %v2808_v19, %v1401_v16 }
 0x313   : > { %v1309_v33 = vmul.f32 %v2800_v13, %v1267_v23  ;;  %v1277_v36 = vld [vmem:[#allocation2 + $0x361] ss:$4 sm:$0xff] }
 0x314   : > { %v1314_v45 = vmul.f32 %v2800_v13, %v1277_v36 }
 0x319   : > { %v970_v42 = vpop.f32.mrf.mxu3 }
 0x31a   : > { %1114 = vst.msk [vmem:[#allocation2 + $0x3b0] sm:$0xff] %vm995_vm1, %v970_v42  ;;  %v1699_v42 = vmul.f32 0.01, %v1635_v30 }
 0x31b   : > { %2389 = vmatmul.msk.bf16.gmra.mxu1 %vm995_vm1, %v1751_v44  ;;  %v1341_v44 = vadd.f32 %v1309_v33, %v1211_v31  ;;  %v1572_v31 = vmul.f32 %v2813_v26, %v1533_v21  ;;  %v1409_v21 = vld [vmem:[#allocation2 + $0x382] ss:$4 sm:$0xff] }
 0x31c   : > { %v1731_v63 = vsel %vm1667_vm7, %v1635_v30, %v1699_v42 }
 0x31d   : > { %v1471_v39 = vadd.f32 %v1439_v54, %v1341_v44  ;;  %v1753_v60 = vpack.c.bf16 %v1732_v53, %v1731_v63  ;;  %v1216_v44 = vmul.f32 %v2798_v11, %v1179_v4  ;;  %v1407_v53 = vld [vmem:[#allocation2 + $0x362] ss:$4 sm:$0xff] }
 0x31e   : > { %v1444_v58 = vmul.f32 %v2808_v19, %v1407_v53 }
 0x31f   : > { %v1346_v56 = vadd.f32 %v1314_v45, %v1216_v44  ;;  %v3228_v45 = vld [vmem:[%s3378_s5] ss:$0 sm:$0xff] }
 0x321   : > { %v972_v24 = vpop.f32.mrf.mxu3  ;;  %v1476_v37 = vadd.f32 %v1444_v58, %v1346_v56 }
 0x322   : > { %1115 = vst.msk [vmem:[#allocation2 + $0x3b8] sm:$0xff] %vm995_vm1, %v972_v24  ;;  %v1569_v24 = vmul.f32 %v2813_v26, %v1527_v57  ;;  %v1405_v57 = vld [vmem:[#allocation2 + $0x342] ss:$4 sm:$0xff] }
 0x324   : > { %v1601_v48 = vadd.f32 %v1569_v24, %v1471_v39  ;;  %v1443_v24 = vmul.f32 %v2808_v19, %v1405_v57 }
 0x326   : > { %v1637_v8 = vadd.f32 %v3101_v61, %v1601_v48 }
 0x328   : > { %v1856_v46 = vpop.f32.mrf.mxu1  ;;  %v1701_v17 = vmul.f32 0.01, %v1637_v8  ;;  %vm1669_vm9 = vcmp.gt.f32.partialorder %v1637_v8, 0.0 }
 0x329   : > { %v975_v10 = vpop.f32.mrf.mxu3  ;;  %v1857_v20 = vadd.f32 %v2945_v28, %v1856_v46  ;;  %v1213_v46 = vmul.f32 %v2798_v11, %v1173_v2 }
 0x32a   : > { %1116 = vst.msk [vmem:[#allocation2 + $0x3c0] sm:$0xff] %vm995_vm1, %v975_v10  ;;  %v1702_v10 = vmul.f32 0.01, %v1638_v5 }
 0x32b   : > { %2390 = vmatmul.msk.bf16.gmra.mxu1 %vm995_vm1, %v1752_v12  ;;  %v1956_v50 = vmul.f32 0.01, %v1857_v20  ;;  %vm1924_vm3 = vcmp.gt.f32.partialorder %v1857_v20, 0.0  ;;  %v1344_v12 = vadd.f32 %v1312_v7, %v1214_v6  ;;  %v1343_v18 = vadd.f32 %v1311_v43, %v1213_v46  ;;  %v1183_v6 = vld [vmem:[#allocation2 + $0x3a0] ss:$4 sm:$0xff] }
 0x32c   : > { %v1734_v23 = vsel %vm1670_vm8, %v1638_v5, %v1702_v10  ;;  %v1281_v7 = vld [vmem:[#allocation2 + $0x3a1] ss:$4 sm:$0xff]  ;;  %v1181_v46 = vld [vmem:[#allocation2 + $0x380] ss:$4 sm:$0xff] }
 0x32d   : > { %v1988_v52 = vsel %vm1924_vm3, %v1857_v20, %v1956_v50  ;;  %v1442_v20 = vmul.f32 %v2808_v19, %v1403_v29  ;;  %v1473_v30 = vadd.f32 %v1441_v25, %v1343_v18  ;;  %v1279_v43 = vld [vmem:[#allocation2 + $0x381] ss:$4 sm:$0xff]  ;;  %v1218_v29 = vmul.f32 %v2798_v11, %v1183_v6 }
 0x32e   : > { %v1316_v10 = vmul.f32 %v2800_v13, %v1281_v7  ;;  %v1315_v16 = vmul.f32 %v2800_v13, %v1279_v43 }
 0x32f   : > { %v1474_v27 = vadd.f32 %v1442_v20, %v1344_v12 }
 0x330   : > { %v1858_v51 = vpop.f32.mrf.mxu1  ;;  %v1348_v20 = vadd.f32 %v1316_v10, %v1218_v29 }
 0x331   : > { %v1859_v34 = vadd.f32 %v2945_v28, %v1858_v51  ;;  %v977_v35 = vpop.f32.mrf.mxu3  ;;  %v1733_v51 = vsel %vm1669_vm9, %v1637_v8, %v1701_v17  ;;  %v1411_v17 = vld [vmem:[#allocation2 + $0x3a2] ss:$4 sm:$0xff] }
 0x332   : > { %1117 = vst.msk [vmem:[#allocation2 + $0x3c8] sm:$0xff] %vm995_vm1, %v977_v35  ;;  %v1754_v50 = vpack.c.bf16 %v1734_v23, %v1733_v51  ;;  %v1604_v35 = vadd.f32 %v1572_v31, %v1474_v27  ;;  %v1446_v27 = vmul.f32 %v2808_v19, %v1411_v17 }
 0x333   : > { %vm1925_vm5 = vcmp.gt.f32.partialorder %v1859_v34, 0.0  ;;  %v1957_v22 = vmul.f32 0.01, %v1859_v34 }
 0x334   : > { %v1640_v42 = vadd.f32 %v3101_v61, %v1604_v35  ;;  %v1478_v31 = vadd.f32 %v1446_v27, %v1348_v20 }
 0x335   : > { %v1989_v55 = vsel %vm1925_vm5, %v1859_v34, %v1957_v22  ;;  %v1571_v34 = vmul.f32 %v2813_v26, %v1531_v38  ;;  %v1177_v22 = vld [vmem:[#allocation2 + $0x340] ss:$4 sm:$0xff]  ;;  %v1541_v38 = vld [vmem:[#allocation2 + $0x3a3] ss:$4 sm:$0xff] }
 0x336   : > { %v2016_v28 = vpack.c.bf16 %v1989_v55, %v1988_v52  ;;  %v1215_v55 = vmul.f32 %v2798_v11, %v1177_v22  ;;  %v1704_v54 = vmul.f32 0.01, %v1640_v42  ;;  %vm1672_vm10 = vcmp.gt.f32.partialorder %v1640_v42, 0.0 }
 0x337   : > { %v1603_v40 = vadd.f32 %v1571_v34, %v1473_v30  ;;  %v1445_v30 = vmul.f32 %v2808_v19, %v1409_v21  ;;  %v1576_v4 = vmul.f32 %v2813_v26, %v1541_v38 }
 0x338   : > { %2405 = vmatmul.msk.bf16.gmra.mxu2 %vm473_vm0, %v2016_v28  ;;  %v1345_v39 = vadd.f32 %v1313_v32, %v1215_v55 }
 0x339   : > { %v980_v59 = vpop.f32.mrf.mxu3  ;;  %v1639_v52 = vadd.f32 %v3101_v61, %v1603_v40  ;;  %v1608_v22 = vadd.f32 %v1576_v4, %v1478_v31 }
 0x33a   : > { %1118 = vst.msk [vmem:[#allocation2 + $0x3d0] sm:$0xff] %vm995_vm1, %v980_v59  ;;  %v1537_v59 = vld [vmem:[#allocation2 + $0x363] ss:$4 sm:$0xff]  ;;  %v1475_v0 = vadd.f32 %v1443_v24, %v1345_v39 }
 0x33b   : > { %2391 = vmatmul.msk.bf16.gmra.mxu1 %vm995_vm1, %v1753_v60  ;;  %v2107_v62 = vpop.f32.mrf.mxu2  ;;  %v1703_v63 = vmul.f32 0.01, %v1639_v52  ;;  %vm1671_vm11 = vcmp.gt.f32.partialorder %v1639_v52, 0.0  ;;  %v1736_v60 = vsel %vm1672_vm10, %v1640_v42, %v1704_v54 }
 0x33c   : > { %v2108_v1 = vadd.f32 %v3052_v49, %v2107_v62  ;;  %v1535_v62 = vld [vmem:[#allocation2 + $0x343] ss:$4 sm:$0xff] }
 0x33d   : > { %v1735_v15 = vsel %vm1671_vm11, %v1639_v52, %v1703_v63  ;;  %v1573_v3 = vmul.f32 %v2813_v26, %v1535_v62 }
 0x33e   : > { %2182 = vst.msk [vmem:[%s3058_s14 + $0x20] sm:$0xff] %vm2177_vm4, %v2108_v1  ;;  %v1574_v1 = vmul.f32 %v2813_v26, %v1537_v59  ;;  %v1755_v2 = vpack.c.bf16 %v1736_v60, %v1735_v15 }
 0x33f   : > { %v1605_v8 = vadd.f32 %v1573_v3, %v1475_v0 }
 0x340   : > { %v1606_v5 = vadd.f32 %v1574_v1, %v1476_v37 }
 0x341   : > { %v982_v9 = vpop.f32.mrf.mxu3  ;;  %v1641_v12 = vadd.f32 %v3101_v61, %v1605_v8 }
 0x342   : > { %1119 = vst.msk [vmem:[#allocation2 + $0x3d8] sm:$0xff] %vm995_vm1, %v982_v9  ;;  %v1642_v9 = vadd.f32 %v3101_v61, %v1606_v5 }
 0x343   : > { %v2109_v14 = vpop.f32.mrf.mxu2  ;;  %v1705_v23 = vmul.f32 0.01, %v1641_v12  ;;  %vm1673_vm13 = vcmp.gt.f32.partialorder %v1641_v12, 0.0 }
 0x344   : > { %v2110_v47 = vadd.f32 %v3052_v49, %v2109_v14  ;;  %v1217_v14 = vmul.f32 %v2798_v11, %v1181_v46  ;;  %v1706_v18 = vmul.f32 0.01, %v1642_v9  ;;  %vm1674_vm12 = vcmp.gt.f32.partialorder %v1642_v9, 0.0 }
 0x345   : > { %v1737_v34 = vsel %vm1673_vm13, %v1641_v12, %v1705_v23 }
 0x346   : > { %2183 = vst.msk [vmem:[%s3058_s14 + $0x28] sm:$0xff] %vm2177_vm4, %v2110_v47  ;;  %v1347_v25 = vadd.f32 %v1315_v16, %v1217_v14  ;;  %v1738_v51 = vsel %vm1674_vm12, %v1642_v9, %v1706_v18 }
 0x347   : > { %v1756_v36 = vpack.c.bf16 %v1738_v51, %v1737_v34 }
 0x348   : > { %v1477_v35 = vadd.f32 %v1445_v30, %v1347_v25 }
 0x349   : > { %v985_v33 = vpop.f32.mrf.mxu3  ;;  %v1185_v55 = vld [vmem:[#allocation2 + $0x3c0] ss:$4 sm:$0xff]  ;;  %v1283_v32 = vld [vmem:[#allocation2 + $0x3c1] ss:$4 sm:$0xff]  ;;  %v1413_v15 = vld [vmem:[#allocation2 + $0x3c2] ss:$4 sm:$0xff] }
 0x34a   : > { %1120 = vst.msk [vmem:[#allocation2 + $0x3e0] sm:$0xff] %vm995_vm1, %v985_v33  ;;  %v1539_v33 = vld [vmem:[#allocation2 + $0x383] ss:$4 sm:$0xff]  ;;  %v1219_v63 = vmul.f32 %v2798_v11, %v1185_v55  ;;  %v1317_v39 = vmul.f32 %v2800_v13, %v1283_v32  ;;  %v1447_v6 = vmul.f32 %v2808_v19, %v1413_v15 }
 0x34b   : > { %2392 = vmatmul.msk.bf16.gmra.mxu1 %vm995_vm1, %v1754_v50  ;;  %v1575_v40 = vmul.f32 %v2813_v26, %v1539_v33  ;;  %v1543_v8 = vld [vmem:[#allocation2 + $0x3c3] ss:$4 sm:$0xff] }
 0x34c   : > { %v1349_v1 = vadd.f32 %v1317_v39, %v1219_v63  ;;  %v1577_v12 = vmul.f32 %v2813_v26, %v1543_v8 }
 0x34d   : > { %v1607_v44 = vadd.f32 %v1575_v40, %v1477_v35 }
 0x34e   : > { %v1479_v9 = vadd.f32 %v1447_v6, %v1349_v1 }
 0x34f   : > { %v1643_v57 = vadd.f32 %v3101_v61, %v1607_v44 }
 0x351   : > { %v987_v28 = vpop.f32.mrf.mxu3  ;;  %v1707_v0 = vmul.f32 0.01, %v1643_v57  ;;  %vm1675_vm3 = vcmp.gt.f32.partialorder %v1643_v57, 0.0 }
 0x352   : > { %1121 = vst.msk [vmem:[#allocation2 + $0x3e8] sm:$0xff] %vm995_vm1, %v987_v28  ;;  %v1644_v28 = vadd.f32 %v3101_v61, %v1608_v22 }
 0x353   : > { %v1739_v43 = vsel %vm1675_vm3, %v1643_v57, %v1707_v0 }
 0x354   : > { %v1708_v24 = vmul.f32 0.01, %v1644_v28  ;;  %vm1676_vm2 = vcmp.gt.f32.partialorder %v1644_v28, 0.0 }
 0x356   : > { %v1740_v5 = vsel %vm1676_vm2, %v1644_v28, %v1708_v24 }
 0x357   : > { %v1757_v10 = vpack.c.bf16 %v1740_v5, %v1739_v43 }
 0x359   : > { %v990_v48 = vpop.f32.mrf.mxu3 }
 0x35a   : > { %1122 = vst.msk [vmem:[#allocation2 + $0x3f0] sm:$0xff] %vm995_vm1, %v990_v48 }
 0x35b   : > { %2393 = vmatmul.msk.bf16.gmra.mxu1 %vm995_vm1, %v1755_v2 }
 0x361   : > { %v992_v47 = vpop.f32.mrf.mxu3 }
 0x362   : > { %1123 = vst.msk [vmem:[#allocation2 + $0x3f8] sm:$0xff] %vm995_vm1, %v992_v47 }
 0x368   : > { %v1861_v50 = vpop.f32.mrf.mxu1 }
 0x369   : > { %v1187_v41 = vld [vmem:[#allocation2 + $0x3e0] ss:$4 sm:$0xff]  ;;  %v1285_v42 = vld [vmem:[#allocation2 + $0x3e1] ss:$4 sm:$0xff]  ;;  %v1862_v52 = vadd.f32 %v3228_v45, %v1861_v50  ;;  %v1415_v60 = vld [vmem:[#allocation2 + $0x3e2] ss:$4 sm:$0xff] }
 0x36a   : > { %v1220_v53 = vmul.f32 %v2798_v11, %v1187_v41  ;;  %v1318_v54 = vmul.f32 %v2800_v13, %v1285_v42  ;;  %v1448_v48 = vmul.f32 %v2808_v19, %v1415_v60  ;;  %v1545_v11 = vld [vmem:[#allocation2 + $0x3e3] ss:$4 sm:$0xff]  ;;  %v1609_v19 = vadd.f32 %v1577_v12, %v1479_v9 }
 0x36b   : > { %2394 = vmatmul.msk.bf16.gmra.mxu1 %vm995_vm1, %v1756_v36  ;;  %v1958_v58 = vmul.f32 0.01, %v1862_v52  ;;  %vm1926_vm14 = vcmp.gt.f32.partialorder %v1862_v52, 0.0  ;;  %v1578_v29 = vmul.f32 %v2813_v26, %v1545_v11 }
 0x36c   : > { %v1350_v37 = vadd.f32 %v1318_v54, %v1220_v53  ;;  %v1645_v21 = vadd.f32 %v3101_v61, %v1609_v19 }
 0x36d   : > { %v1990_v2 = vsel %vm1926_vm14, %v1862_v52, %v1958_v58 }
 0x36e   : > { %v1480_v7 = vadd.f32 %v1448_v48, %v1350_v37  ;;  %v1709_v30 = vmul.f32 0.01, %v1645_v21  ;;  %vm1677_vm8 = vcmp.gt.f32.partialorder %v1645_v21, 0.0 }
 0x370   : > { %v1863_v56 = vpop.f32.mrf.mxu1  ;;  %v1610_v14 = vadd.f32 %v1578_v29, %v1480_v7  ;;  %v1741_v35 = vsel %vm1677_vm8, %v1645_v21, %v1709_v30 }
 0x371   : > { %v1864_v59 = vadd.f32 %v3228_v45, %v1863_v56 }
 0x372   : > { %v1646_v18 = vadd.f32 %v3101_v61, %v1610_v14 }
 0x373   : > { %vm1927_vm15 = vcmp.gt.f32.partialorder %v1864_v59, 0.0  ;;  %v1959_v62 = vmul.f32 0.01, %v1864_v59 }
 0x374   : > { %v1710_v25 = vmul.f32 0.01, %v1646_v18  ;;  %vm1678_vm7 = vcmp.gt.f32.partialorder %v1646_v18, 0.0 }
 0x375   : > { %v1991_v3 = vsel %vm1927_vm15, %v1864_v59, %v1959_v62 }
 0x376   : > { %v2017_v13 = vpack.c.bf16 %v1991_v3, %v1990_v2  ;;  %v1742_v34 = vsel %vm1678_vm7, %v1646_v18, %v1710_v25  ;;  %v3268_v3 = vld [vmem:[%s3380_s7] ss:$0 sm:$0xff] }
 0x377   : > { %v1758_v4 = vpack.c.bf16 %v1742_v34, %v1741_v35 }
 0x378   : > { %v1866_v46 = vpop.f32.mrf.mxu1  ;;  %2406 = vmatmul.msk.bf16.gmra.mxu2 %vm473_vm0, %v2017_v13 }
 0x379   : > { %v1867_v17 = vadd.f32 %v3228_v45, %v1866_v46 }
 0x37b   : > { %2395 = vmatmul.msk.bf16.gmra.mxu1 %vm995_vm1, %v1757_v10  ;;  %v2112_v16 = vpop.f32.mrf.mxu2  ;;  %v1960_v23 = vmul.f32 0.01, %v1867_v17  ;;  %vm1928_vm5 = vcmp.gt.f32.partialorder %v1867_v17, 0.0 }
 0x37c   : > { %v2113_v47 = vadd.f32 %v3052_v49, %v2112_v16 }
 0x37d   : > { %v1992_v31 = vsel %vm1928_vm5, %v1867_v17, %v1960_v23 }
 0x37e   : > { %2184 = vst.msk [vmem:[%s3058_s14 + $0x30] sm:$0xff] %vm2177_vm4, %v2113_v47 }
 0x380   : > { %v1868_v20 = vpop.f32.mrf.mxu1 }
 0x381   : > { %v1869_v26 = vadd.f32 %v3228_v45, %v1868_v20 }
 0x383   : > { %vm1929_vm6 = vcmp.gt.f32.partialorder %v1869_v26, 0.0  ;;  %v1961_v27 = vmul.f32 0.01, %v1869_v26  ;;  %v2114_v38 = vpop.f32.mrf.mxu2 }
 0x384   : > { %v2115_v51 = vadd.f32 %v3052_v49, %v2114_v38 }
 0x385   : > { %v1993_v33 = vsel %vm1929_vm6, %v1869_v26, %v1961_v27 }
 0x386   : > { %v2018_v50 = vpack.c.bf16 %v1993_v33, %v1992_v31  ;;  %2185 = vst.msk [vmem:[%s3058_s14 + $0x38] sm:$0xff] %vm2177_vm4, %v2115_v51 }
 0x388   : > { %v1871_v61 = vpop.f32.mrf.mxu1  ;;  %2407 = vmatmul.msk.bf16.gmra.mxu2 %vm473_vm0, %v2018_v50 }
 0x389   : > { %v1872_v36 = vadd.f32 %v3228_v45, %v1871_v61 }
 0x38b   : > { %2396 = vmatmul.msk.bf16.gmra.mxu1 %vm995_vm1, %v1758_v4  ;;  %v1962_v22 = vmul.f32 0.01, %v1872_v36  ;;  %vm1930_vm9 = vcmp.gt.f32.partialorder %v1872_v36, 0.0 }
 0x38d   : > { %v1994_v42 = vsel %vm1930_vm9, %v1872_v36, %v1962_v22 }
 0x390   : > { %v1873_v40 = vpop.f32.mrf.mxu1 }
 0x391   : > { %v1874_v49 = vadd.f32 %v3228_v45, %v1873_v40 }
 0x393   : > { %vm1931_vm10 = vcmp.gt.f32.partialorder %v1874_v49, 0.0  ;;  %v1963_v41 = vmul.f32 0.01, %v1874_v49 }
 0x395   : > { %v1995_v44 = vsel %vm1931_vm10, %v1874_v49, %v1963_v41 }
 0x396   : > { %v2019_v52 = vpack.c.bf16 %v1995_v44, %v1994_v42 }
 0x398   : > { %v1876_v55 = vpop.f32.mrf.mxu1  ;;  %2408 = vmatmul.msk.bf16.gmra.mxu2 %vm473_vm0, %v2019_v52 }
 0x399   : > { %v1877_v32 = vadd.f32 %v3228_v45, %v1876_v55 }
 0x39b   : > { %v1964_v53 = vmul.f32 0.01, %v1877_v32  ;;  %vm1932_vm1 = vcmp.gt.f32.partialorder %v1877_v32, 0.0 }
 0x39d   : > { %v1996_v57 = vsel %vm1932_vm1, %v1877_v32, %v1964_v53 }
 0x3a0   : > { %v1878_v28 = vpop.f32.mrf.mxu1 }
 0x3a1   : > { %v1879_v54 = vadd.f32 %v3228_v45, %v1878_v28 }
 0x3a3   : > { %vm1933_vm11 = vcmp.gt.f32.partialorder %v1879_v54, 0.0  ;;  %v1965_v56 = vmul.f32 0.01, %v1879_v54 }
 0x3a5   : > { %v1997_v63 = vsel %vm1933_vm11, %v1879_v54, %v1965_v56 }
 0x3a6   : > { %v2020_v39 = vpack.c.bf16 %v1997_v63, %v1996_v57 }
 0x3a8   : > { %v1881_v58 = vpop.f32.mrf.mxu1  ;;  %2409 = vmatmul.msk.bf16.gmra.mxu2 %vm473_vm0, %v2020_v39 }
 0x3a9   : > { %v1882_v59 = vadd.f32 %v3228_v45, %v1881_v58 }
 0x3ab   : > { %v1966_v24 = vmul.f32 0.01, %v1882_v59  ;;  %vm1934_vm12 = vcmp.gt.f32.partialorder %v1882_v59, 0.0 }
 0x3ad   : > { %v1998_v15 = vsel %vm1934_vm12, %v1882_v59, %v1966_v24 }
 0x3b0   : > { %v1883_v60 = vpop.f32.mrf.mxu1 }
 0x3b1   : > { %v1884_v37 = vadd.f32 %v3228_v45, %v1883_v60 }
 0x3b3   : > { %vm1935_vm13 = vcmp.gt.f32.partialorder %v1884_v37, 0.0  ;;  %v1967_v62 = vmul.f32 0.01, %v1884_v37 }
 0x3b5   : > { %v1999_v0 = vsel %vm1935_vm13, %v1884_v37, %v1967_v62 }
 0x3b6   : > { %v2021_v1 = vpack.c.bf16 %v1999_v0, %v1998_v15 }
 0x3b8   : > { %v1886_v48 = vpop.f32.mrf.mxu1  ;;  %2410 = vmatmul.msk.bf16.gmra.mxu2 %vm473_vm0, %v2021_v1 }
 0x3b9   : > { %v1887_v13 = vadd.f32 %v3228_v45, %v1886_v48 }
 0x3bb   : > { %v2117_v2 = vpop.f32.mrf.mxu2  ;;  %v1968_v6 = vmul.f32 0.01, %v1887_v13  ;;  %vm1936_vm14 = vcmp.gt.f32.partialorder %v1887_v13, 0.0 }
 0x3bc   : > { %v2118_v11 = vadd.f32 %v3268_v3, %v2117_v2 }
 0x3bd   : > { %v2000_v9 = vsel %vm1936_vm14, %v1887_v13, %v1968_v6 }
 0x3be   : > { %2186 = vst.msk [vmem:[%s3058_s14 + $0x40] sm:$0xff] %vm2177_vm4, %v2118_v11 }
 0x3c0   : > { %v1888_v5 = vpop.f32.mrf.mxu1 }
 0x3c1   : > { %v1889_v7 = vadd.f32 %v3228_v45, %v1888_v5 }
 0x3c3   : > { %vm1937_vm15 = vcmp.gt.f32.partialorder %v1889_v7, 0.0  ;;  %v1969_v8 = vmul.f32 0.01, %v1889_v7  ;;  %v2119_v46 = vpop.f32.mrf.mxu2 }
 0x3c4   : > { %v2120_v43 = vadd.f32 %v3268_v3, %v2119_v46 }
 0x3c5   : > { %v2001_v29 = vsel %vm1937_vm15, %v1889_v7, %v1969_v8 }
 0x3c6   : > { %v2022_v10 = vpack.c.bf16 %v2001_v29, %v2000_v9  ;;  %2187 = vst.msk [vmem:[%s3058_s14 + $0x48] sm:$0xff] %vm2177_vm4, %v2120_v43 }
 0x3c8   : > { %v1891_v12 = vpop.f32.mrf.mxu1  ;;  %2411 = vmatmul.msk.bf16.gmra.mxu2 %vm473_vm0, %v2022_v10 }
 0x3c9   : > { %v1892_v14 = vadd.f32 %v3228_v45, %v1891_v12 }
 0x3cb   : > { %v1970_v47 = vmul.f32 0.01, %v1892_v14  ;;  %vm1938_vm2 = vcmp.gt.f32.partialorder %v1892_v14, 0.0 }
 0x3cd   : > { %v2002_v18 = vsel %vm1938_vm2, %v1892_v14, %v1970_v47 }
 0x3d0   : > { %v1893_v16 = vpop.f32.mrf.mxu1 }
 0x3d1   : > { %v1894_v19 = vadd.f32 %v3228_v45, %v1893_v16 }
 0x3d3   : > { %vm1939_vm3 = vcmp.gt.f32.partialorder %v1894_v19, 0.0  ;;  %v1971_v17 = vmul.f32 0.01, %v1894_v19 }
 0x3d5   : > { %v2003_v20 = vsel %vm1939_vm3, %v1894_v19, %v1971_v17 }
 0x3d6   : > { %v2023_v21 = vpack.c.bf16 %v2003_v20, %v2002_v18 }
 0x3d8   : > { %v1896_v23 = vpop.f32.mrf.mxu1  ;;  %2412 = vmatmul.msk.bf16.gmra.mxu2 %vm473_vm0, %v2023_v21 }
 0x3d9   : > { %v1897_v26 = vadd.f32 %v3228_v45, %v1896_v23 }
 0x3db   : > { %v1972_v27 = vmul.f32 0.01, %v1897_v26  ;;  %vm1940_vm5 = vcmp.gt.f32.partialorder %v1897_v26, 0.0 }
 0x3dd   : > { %v2004_v30 = vsel %vm1940_vm5, %v1897_v26, %v1972_v27 }
 0x3e0   : > { %v1898_v25 = vpop.f32.mrf.mxu1 }
 0x3e1   : > { %v1899_v38 = vadd.f32 %v3228_v45, %v1898_v25 }
 0x3e3   : > { %vm1941_vm6 = vcmp.gt.f32.partialorder %v1899_v38, 0.0  ;;  %v1973_v51 = vmul.f32 0.01, %v1899_v38 }
 0x3e5   : > { %v2005_v31 = vsel %vm1941_vm6, %v1899_v38, %v1973_v51 }
 0x3e6   : > { %v2024_v33 = vpack.c.bf16 %v2005_v31, %v2004_v30 }
 0x3e8   : > { %v1901_v50 = vpop.f32.mrf.mxu1  ;;  %2413 = vmatmul.msk.bf16.gmra.mxu2 %vm473_vm0, %v2024_v33 }
 0x3e9   : > { %v1902_v34 = vadd.f32 %v3228_v45, %v1901_v50 }
 0x3eb   : > { %v1974_v35 = vmul.f32 0.01, %v1902_v34  ;;  %vm1942_vm7 = vcmp.gt.f32.partialorder %v1902_v34, 0.0 }
 0x3ed   : > { %v2006_v40 = vsel %vm1942_vm7, %v1902_v34, %v1974_v35 }
 0x3f0   : > { %v1903_v61 = vpop.f32.mrf.mxu1 }
 0x3f1   : > { %v1904_v4 = vadd.f32 %v3228_v45, %v1903_v61 }
 0x3f3   : > { %vm1943_vm8 = vcmp.gt.f32.partialorder %v1904_v4, 0.0  ;;  %v1975_v36 = vmul.f32 0.01, %v1904_v4 }
 0x3f5   : > { %v2007_v22 = vsel %vm1943_vm8, %v1904_v4, %v1975_v36 }
 0x3f6   : > { %v2025_v49 = vpack.c.bf16 %v2007_v22, %v2006_v40 }
 0x3f8   : > { %v1906_v41 = vpop.f32.mrf.mxu1  ;;  %2414 = vmatmul.msk.bf16.gmra.mxu2 %vm473_vm0, %v2025_v49 }
 0x3f9   : > { %v1907_v52 = vadd.f32 %v3228_v45, %v1906_v41 }
 0x3fb   : > { %v2122_v42 = vpop.f32.mrf.mxu2  ;;  %v1976_v32 = vmul.f32 0.01, %v1907_v52  ;;  %vm1944_vm9 = vcmp.gt.f32.partialorder %v1907_v52, 0.0 }
 0x3fc   : > { %v2123_v44 = vadd.f32 %v3268_v3, %v2122_v42 }
 0x3fd   : > { %v2008_v57 = vsel %vm1944_vm9, %v1907_v52, %v1976_v32 }
 0x3fe   : > { %2188 = vst.msk [vmem:[%s3058_s14 + $0x50] sm:$0xff] %vm2177_vm4, %v2123_v44 }
 0x400   : > { %v1908_v55 = vpop.f32.mrf.mxu1 }
 0x401   : > { %v1909_v28 = vadd.f32 %v3228_v45, %v1908_v55 }
 0x403   : > { %vm1945_vm10 = vcmp.gt.f32.partialorder %v1909_v28, 0.0  ;;  %v1977_v53 = vmul.f32 0.01, %v1909_v28  ;;  %v2124_v54 = vpop.f32.mrf.mxu2 }
 0x404   : > { %v2125_v56 = vadd.f32 %v3268_v3, %v2124_v54 }
 0x405   : > { %v2009_v63 = vsel %vm1945_vm10, %v1909_v28, %v1977_v53 }
 0x406   : > { %v2026_v39 = vpack.c.bf16 %v2009_v63, %v2008_v57  ;;  %2189 = vst.msk [vmem:[%s3058_s14 + $0x58] sm:$0xff] %vm2177_vm4, %v2125_v56 }
 0x408   : > { %v1911_v58 = vpop.f32.mrf.mxu1  ;;  %2415 = vmatmul.msk.bf16.gmra.mxu2 %vm473_vm0, %v2026_v39 }
 0x409   : > { %v1912_v24 = vadd.f32 %v3228_v45, %v1911_v58 }
 0x40b   : > { %v2127_v59 = vpop.f32.mrf.mxu2  ;;  %v1978_v62 = vmul.f32 0.01, %v1912_v24  ;;  %vm1946_vm1 = vcmp.gt.f32.partialorder %v1912_v24, 0.0 }
 0x40c   : > { %v2128_v60 = vadd.f32 %v3268_v3, %v2127_v59 }
 0x40d   : > { %v2010_v2 = vsel %vm1946_vm1, %v1912_v24, %v1978_v62 }
 0x40e   : > { %2190 = vst.msk [vmem:[%s3058_s14 + $0x60] sm:$0xff] %vm2177_vm4, %v2128_v60 }
 0x410   : > { %v1913_v37 = vpop.f32.mrf.mxu1 }
 0x411   : > { %v1914_v15 = vadd.f32 %v3228_v45, %v1913_v37 }
 0x413   : > { %vm1947_vm11 = vcmp.gt.f32.partialorder %v1914_v15, 0.0  ;;  %v1979_v0 = vmul.f32 0.01, %v1914_v15  ;;  %v2129_v1 = vpop.f32.mrf.mxu2 }
 0x414   : > { %v2130_v48 = vadd.f32 %v3268_v3, %v2129_v1 }
 0x415   : > { %v2011_v11 = vsel %vm1947_vm11, %v1914_v15, %v1979_v0 }
 0x416   : > { %v2027_v13 = vpack.c.bf16 %v2011_v11, %v2010_v2  ;;  %2191 = vst.msk [vmem:[%s3058_s14 + $0x68] sm:$0xff] %vm2177_vm4, %v2130_v48 }
 0x418   : > { %2416 = vmatmul.msk.bf16.gmra.mxu2 %vm473_vm0, %v2027_v13 }
 0x41b   : > { %v2132_v5 = vpop.f32.mrf.mxu2 }
 0x41c   : > { %v2133_v45 = vadd.f32 %v3268_v3, %v2132_v5 }
 0x41e   : > { %2192 = vst.msk [vmem:[%s3058_s14 + $0x70] sm:$0xff] %vm2177_vm4, %v2133_v45 }
 0x423   : > { %v2134_v6 = vpop.f32.mrf.mxu2 }
 0x424   : > { %v2135_v7 = vadd.f32 %v3268_v3, %v2134_v6 }
 0x426   : > { %2193 = vst.msk [vmem:[%s3058_s14 + $0x78] sm:$0xff] %vm2177_vm4, %v2135_v7 }
 0x42b   : > { %v2137_v8 = vpop.f32.mrf.mxu2 }
 0x42c   : > { %v2138_v46 = vadd.f32 %v3268_v3, %v2137_v8 }
 0x42e   : > { %2194 = vst.msk [vmem:[%s3058_s14 + $0x80] sm:$0xff] %vm2177_vm4, %v2138_v46 }
 0x433   : > { %v2139_v43 = vpop.f32.mrf.mxu2 }
 0x434   : > { %v2140_v9 = vadd.f32 %v3268_v3, %v2139_v43 }
 0x436   : > { %2195 = vst.msk [vmem:[%s3058_s14 + $0x88] sm:$0xff] %vm2177_vm4, %v2140_v9 }
 0x43b   : > { %v2142_v29 = vpop.f32.mrf.mxu2 }
 0x43c   : > { %v2143_v10 = vadd.f32 %v3268_v3, %v2142_v29 }
 0x43e   : > { %2196 = vst.msk [vmem:[%s3058_s14 + $0x90] sm:$0xff] %vm2177_vm4, %v2143_v10 }
 0x443   : > { %v2144_v12 = vpop.f32.mrf.mxu2 }
 0x444   : > { %v2145_v14 = vadd.f32 %v3268_v3, %v2144_v12 }
 0x446   : > { %2197 = vst.msk [vmem:[%s3058_s14 + $0x98] sm:$0xff] %vm2177_vm4, %v2145_v14 }
 0x44b   : > { %v2147_v16 = vpop.f32.mrf.mxu2 }
 0x44c   : > { %v2148_v47 = vadd.f32 %v3268_v3, %v2147_v16 }
 0x44e   : > { %2198 = vst.msk [vmem:[%s3058_s14 + $0xa0] sm:$0xff] %vm2177_vm4, %v2148_v47 }
 0x453   : > { %v2149_v19 = vpop.f32.mrf.mxu2 }
 0x454   : > { %v2150_v17 = vadd.f32 %v3268_v3, %v2149_v19 }
 0x456   : > { %2199 = vst.msk [vmem:[%s3058_s14 + $0xa8] sm:$0xff] %vm2177_vm4, %v2150_v17 }
 0x45b   : > { %v2152_v18 = vpop.f32.mrf.mxu2 }
 0x45c   : > { %v2153_v20 = vadd.f32 %v3268_v3, %v2152_v18 }
 0x45e   : > { %2200 = vst.msk [vmem:[%s3058_s14 + $0xb0] sm:$0xff] %vm2177_vm4, %v2153_v20 }
 0x463   : > { %v2154_v21 = vpop.f32.mrf.mxu2 }
 0x464   : > { %v2155_v23 = vadd.f32 %v3268_v3, %v2154_v21 }
 0x466   : > { %2201 = vst.msk [vmem:[%s3058_s14 + $0xb8] sm:$0xff] %vm2177_vm4, %v2155_v23 }
 0x46b   : > { %v2157_v26 = vpop.f32.mrf.mxu2 }
 0x46c   : > { %v2158_v25 = vadd.f32 %v3268_v3, %v2157_v26 }
 0x46e   : > { %2202 = vst.msk [vmem:[%s3058_s14 + $0xc0] sm:$0xff] %vm2177_vm4, %v2158_v25 }
 0x473   : > { %v2159_v27 = vpop.f32.mrf.mxu2 }
 0x474   : > { %v2160_v38 = vadd.f32 %v3268_v3, %v2159_v27 }
 0x476   : > { %2203 = vst.msk [vmem:[%s3058_s14 + $0xc8] sm:$0xff] %vm2177_vm4, %v2160_v38 }
 0x47b   : > { %v2162_v51 = vpop.f32.mrf.mxu2 }
 0x47c   : > { %v2163_v30 = vadd.f32 %v3268_v3, %v2162_v51 }
 0x47e   : > { %2204 = vst.msk [vmem:[%s3058_s14 + $0xd0] sm:$0xff] %vm2177_vm4, %v2163_v30 }
 0x483   : > { %v2164_v31 = vpop.f32.mrf.mxu2 }
 0x484   : > { %v2165_v33 = vadd.f32 %v3268_v3, %v2164_v31 }
 0x486   : > { %2205 = vst.msk [vmem:[%s3058_s14 + $0xd8] sm:$0xff] %vm2177_vm4, %v2165_v33 }
 0x48b   : > { %v2167_v50 = vpop.f32.mrf.mxu2 }
 0x48c   : > { %v2168_v34 = vadd.f32 %v3268_v3, %v2167_v50 }
 0x48e   : > { %2206 = vst.msk [vmem:[%s3058_s14 + $0xe0] sm:$0xff] %vm2177_vm4, %v2168_v34 }
 0x493   : > { %v2169_v61 = vpop.f32.mrf.mxu2 }
 0x494   : > { %v2170_v35 = vadd.f32 %v3268_v3, %v2169_v61 }
 0x496   : > { %2207 = vst.msk [vmem:[%s3058_s14 + $0xe8] sm:$0xff] %vm2177_vm4, %v2170_v35 }
 0x49b   : > { %v2172_v4 = vpop.f32.mrf.mxu2 }
 0x49c   : > { %v2173_v36 = vadd.f32 %v3268_v3, %v2172_v4 }
 0x49e   : > { %2208 = vst.msk [vmem:[%s3058_s14 + $0xf0] sm:$0xff] %vm2177_vm4, %v2173_v36 }
 0x4a3   : > { %v2174_v40 = vpop.f32.mrf.mxu2 }
 0x4a4   : > { %v2175_v22 = vadd.f32 %v3268_v3, %v2174_v40 }
 0x4a6   : > { %2209 = vst.msk [vmem:[%s3058_s14 + $0xf8] sm:$0xff] %vm2177_vm4, %v2175_v22 }
 0x4a7 PF: > { %s3391_s25 = sld [smem:[#allocation9_spill]]  ;;  %p19_p8 = scmp.ge.s32.totalorder %s2641_s10, 6  }
 0x4a8   : > { %s3392_s27 = smov %s2562_s28  ;;  %s3393_s28 = smov %s2566_s29 }
 0x4a9   : > { %s3395_s30 = smov %s2641_s10  ;;  %21 = sbr.rel (!%p19_p8) target bundleno = 6 (0x6), region = 224 }
 0x4ad   : > { %s3394_s29 = smov %s3391_s25 }
 0x4ae   :  { %2232 = vsyncpa [#allocation4], 1 }
 0x4af   :  { %2234 = vsyncpa [#allocation4 + $0x1], 1 }
 0x4b0   :  { %2235 = vsyncpa [#allocation5], 1 }
 0x4b1   :  { %2237 = vsyncpa [#allocation5 + $0x1], 1 }

</bundles_post_ra>
